<compile_context>
chip_gen: v5e
topology: v5e:2x2
jax: 0.10.0
libtpu: 0.0.40
codegen_flags: <defaults>
</compile_context>

<pallas_src>
import functools

import numpy as np

import jax
import jax.numpy as jnp
from jax.experimental import pallas as pl
from jax.experimental.pallas import tpu as pltpu


# ---------------------------------------------------------------------------
# Host-side constant matrices (built once per shape, at trace time).
# ---------------------------------------------------------------------------
def _adaptive_pool_matrix(h, w, b):
    """(b*b, h*w) lane-dense matrix P: pooled[j] = sum_l P[j, l] * x_flat[l].

    Matches torch.nn.AdaptiveAvgPool2d window rule:
      start = floor(i * H / b), end = ceil((i + 1) * H / b).
    """
    p_mat = np.zeros((b * b, h * w), np.float32)
    for p in range(b):
        h0 = (p * h) // b
        h1 = ((p + 1) * h + b - 1) // b
        for q in range(b):
            w0 = (q * w) // b
            w1 = ((q + 1) * w + b - 1) // b
            inv_area = 1.0 / float((h1 - h0) * (w1 - w0))
            for hh in range(h0, h1):
                for ww in range(w0, w1):
                    p_mat[p * b + q, hh * w + ww] = inv_area
    return p_mat


def _linear_interp_matrix(out_size, in_size):
    """(out_size, in_size) 1-D linear interpolation, align_corners=True."""
    a = np.zeros((out_size, in_size), np.float32)
    if in_size == 1 or out_size == 1:
        a[:, 0] = 1.0
        return a
    scale = (in_size - 1) / (out_size - 1)
    for i in range(out_size):
        s = i * scale
        i0 = min(int(np.floor(s)), in_size - 2)
        fr = s - i0
        a[i, i0] = 1.0 - fr
        a[i, i0 + 1] = fr
    return a


def _upsample_matrix(h, w, b):
    """(b*b, h*w) matrix M so up_flat = feat_flat @ M (bilinear, align_corners)."""
    ah = _linear_interp_matrix(h, b)          # (H, b)
    aw = _linear_interp_matrix(w, b)          # (W, b)
    m = np.einsum("hp,wq->pqhw", ah, aw).reshape(b * b, h * w)
    return np.ascontiguousarray(m, dtype=np.float32)


def _fuse_tap_masks(h, w):
    """(9, 1, h*w) masks killing taps that fall outside the zero-padded image.

    Needed because pltpu.roll wraps around (the zero pad of the original
    pad+slice formulation is gone): tap (dy, dx) must be zero on row h==0
    (dy=0), row h==H-1 (dy=2), col w==0 (dx=0), col w==W-1 (dx=2).
    """
    l = h * w
    hh = np.arange(l) // w
    ww = np.arange(l) % w
    row = {0: hh != 0, 1: np.ones(l, bool), 2: hh != h - 1}
    col = {0: ww != 0, 1: np.ones(l, bool), 2: ww != w - 1}
    masks = np.zeros((9, 1, l), np.float32)
    for dy in range(3):
        for dx in range(3):
            masks[dy * 3 + dx, 0, :] = (row[dy] & col[dx]).astype(np.float32)
    return masks


# ---------------------------------------------------------------------------
# Pallas kernel: one batch element per grid step, everything fused.
# ---------------------------------------------------------------------------
def ppm1_kernel(x_ref, pool_ref, w1_ref, up_ref, kf_ref, mask_ref, alpha_ref,
                out_ref, *, img_w):
    # x_ref    : (1, C, L)        flattened input image (L = H*W on lanes)
    # pool_ref : (NB, B2, L)      lane-dense adaptive-avg-pool matrices (0-padded rows)
    # w1_ref   : (NB*R, C)        stacked 1x1 conv weights
    # up_ref   : (NB, B2, L)      bilinear upsample matrices (0-padded rows)
    # kf_ref   : (C, 9*Ctot)      fuse 3x3 conv weight, taps stacked along K
    # mask_ref : (9, 1, L)        per-tap boundary masks
    # alpha_ref: (NB + 1,) SMEM   PReLU alphas (branches..., fuse)
    # out_ref  : (1, C, L)
    l = x_ref.shape[2]
    nb = pool_ref.shape[0]
    r = w1_ref.shape[0] // nb

    x = x_ref[0].astype(jnp.float32)                                   # (C, L)

    # ---- branches: one batched 1x1 conv, then pool -> PReLU -> upsample ----
    # (1x1 conv is channel-only, pooling is spatial-only, so they commute.)
    y = jnp.dot(w1_ref[...].astype(jnp.float32), x,
                preferred_element_type=jnp.float32)                    # (NB*R, L)

    ups = []
    for k in range(nb):
        yk = y[k * r:(k + 1) * r]                                      # (R, L)
        pooled = jax.lax.dot_general(
            yk, pool_ref[k].astype(jnp.float32),
            dimension_numbers=(((1,), (1,)), ((), ())),
            preferred_element_type=jnp.float32)                        # (R, B2)
        a_k = alpha_ref[k]
        feat = jnp.where(pooled > 0, pooled, a_k * pooled)             # PReLU
        ups.append(jnp.dot(feat, up_ref[k].astype(jnp.float32),
                           preferred_element_type=jnp.float32))        # (R, L)

    # ---- channel concat (sublane axis), tiny ----
    cat = jnp.concatenate([x] + ups, axis=0)                           # (Ctot, L)

    # ---- 3x3 fuse conv (zero padding): 9 rolled+masked taps stacked along the
    #      contraction axis, consumed by a single (C, 9*Ctot) @ (9*Ctot, L) matmul.
    slabs = []
    for dy in range(3):
        for dx in range(3):
            t = dy * 3 + dx
            shift = (dy - 1) * img_w + (dx - 1)
            if shift == 0:
                slabs.append(cat)                                      # center tap
            else:
                rolled = pltpu.roll(cat, (-shift) % l, axis=1)         # XLU slot
                slabs.append(rolled * mask_ref[t])
    stack = jnp.concatenate(slabs, axis=0)                             # (9*Ctot, L)

    acc = jnp.dot(kf_ref[...].astype(jnp.float32), stack,
                  preferred_element_type=jnp.float32)                  # (C, L)
    a_fuse = alpha_ref[nb]
    acc = jnp.where(acc > 0, acc, a_fuse * acc)                        # final PReLU
    out_ref[...] = acc[None].astype(out_ref.dtype)


# ---------------------------------------------------------------------------
# Wrapper
# ---------------------------------------------------------------------------
def ppm1_forward(x, w_branch, a_branch, w_fuse, a_fuse, bins):
    """PPM1.forward.  x: (N, C, H, W) NCHW.  Parameters in PyTorch shapes:
       w_branch (NB, R, C, 1, 1), a_branch (NB,), w_fuse (C, C+NB*R, 3, 3),
       a_fuse scalar."""
    n, c, h, w = x.shape
    nb = len(bins)
    r = w_branch.shape[1]
    c_tot = c + nb * r
    l = h * w
    b2 = max(b * b for b in bins)

    # Constant linear maps (lane-dense): adaptive pooling and bilinear upsample.
    pool_np = np.zeros((nb, b2, l), np.float32)
    up_np = np.zeros((nb, b2, l), np.float32)
    for k, b in enumerate(bins):
        pool_np[k, :b * b, :] = _adaptive_pool_matrix(h, w, b)
        up_np[k, :b * b, :] = _upsample_matrix(h, w, b)
    pool_mat = jnp.asarray(pool_np)
    up_mat = jnp.asarray(up_np)
    masks = jnp.asarray(_fuse_tap_masks(h, w))                          # (9, 1, L)

    # Weights in kernel-friendly shapes (tiny host-side reshapes of weights only).
    w1 = jnp.reshape(w_branch, (nb * r, c)).astype(jnp.float32)         # (NB*R, C)
    kf = jnp.transpose(w_fuse, (0, 2, 3, 1)).reshape(
        c, 9 * c_tot).astype(jnp.float32)                               # (C, 9*Ctot)
    alphas = jnp.concatenate(
        [jnp.reshape(a_branch, (nb,)).astype(jnp.float32),
         jnp.reshape(a_fuse, (1,)).astype(jnp.float32)])                # (NB+1,)

    xf = x.reshape(n, c, l)   # free reshape: lane axis carries H*W

    kernel = functools.partial(ppm1_kernel, img_w=w)

    out_flat = pl.pallas_call(
        kernel,
        out_shape=jax.ShapeDtypeStruct((n, c, l), x.dtype),
        grid=(n,),
        in_specs=[
            pl.BlockSpec((1, c, l), lambda i: (i, 0, 0)),
            pl.BlockSpec((nb, b2, l), lambda i: (0, 0, 0)),
            pl.BlockSpec((nb * r, c), lambda i: (0, 0)),
            pl.BlockSpec((nb, b2, l), lambda i: (0, 0, 0)),
            pl.BlockSpec((c, 9 * c_tot), lambda i: (0, 0)),
            pl.BlockSpec((9, 1, l), lambda i: (0, 0, 0)),
            pl.BlockSpec(memory_space=pltpu.MemorySpace.SMEM),          # alphas
        ],
        out_specs=pl.BlockSpec((1, c, l), lambda i: (i, 0, 0)),
        compiler_params=pltpu.CompilerParams(
            dimension_semantics=("parallel",)),
    )(xf, pool_mat, w1, up_mat, kf, masks, alphas)

    return out_flat.reshape(n, c, h, w)


# ---------------------------------------------------------------------------
# Pure-JAX reference (independent math path) for the correctness check.
# ---------------------------------------------------------------------------
def _bilinear_upsample_ref(img, out_h, out_w):
    """F.interpolate(mode='bilinear', align_corners=True), NCHW, via gathers."""
    in_h, in_w = img.shape[2], img.shape[3]

    def coords(out_size, in_size):
        if in_size == 1:
            idx = jnp.zeros((out_size,), jnp.int32)
            return idx, idx, jnp.zeros((out_size,), jnp.float32)
        s = jnp.arange(out_size, dtype=jnp.float32) * (
            (in_size - 1) / (out_size - 1))
        i0 = jnp.clip(jnp.floor(s).astype(jnp.int32), 0, in_size - 2)
        return i0, i0 + 1, s - i0.astype(jnp.float32)

    h0, h1, fh = coords(out_h, in_h)
    w0, w1, fw = coords(out_w, in_w)
    v00 = img[:, :, h0][:, :, :, w0]
    v01 = img[:, :, h0][:, :, :, w1]
    v10 = img[:, :, h1][:, :, :, w0]
    v11 = img[:, :, h1][:, :, :, w1]
    fh = fh[None, None, :, None]
    fw = fw[None, None, None, :]
    top = v00 * (1.0 - fw) + v01 * fw
    bot = v10 * (1.0 - fw) + v11 * fw
    return top * (1.0 - fh) + bot * fh


def ppm1_reference(x, w_branch, a_branch, w_fuse, a_fuse, bins):
    n, c, h, w = x.shape
    outs = [x]
    for k, b in enumerate(bins):
        assert h % b == 0 and w % b == 0, "reference assumes divisible bins"
        pooled = x.reshape(n, c, b, h // b, b, w // b).mean(axis=(3, 5))
        feat = jnp.einsum("rc,ncpq->nrpq", w_branch[k, :, :, 0, 0], pooled)
        feat = jnp.where(feat > 0, feat, a_branch[k] * feat)          # PReLU
        outs.append(_bilinear_upsample_ref(feat, h, w))
    cat = jnp.concatenate(outs, axis=1)
    fused = jax.lax.conv_general_dilated(
        cat, w_fuse, window_strides=(1, 1), padding=((1, 1), (1, 1)),
        dimension_numbers=("NCHW", "OIHW", "NCHW"))
    return jnp.where(fused > 0, fused, a_fuse * fused)                # PReLU


if __name__ == "__main__":
    key = jax.random.PRNGKey(0)
    k_x, k_wb, k_wf = jax.random.split(key, 3)

    N, C, H, W = 2, 4, 16, 16            # in_dim = 4
    R = 2                                # reduction_dim = 2
    bins = (1, 2, 4, 8)                  # 4 bins (fuse expects reduction_dim * 4)
    Ctot = C + len(bins) * R

    x = jax.random.normal(k_x, (N, C, H, W), dtype=jnp.float32)

    # Parameters in their native PyTorch shapes (bias-free convs, scalar PReLU).
    w_branch = jax.random.normal(
        k_wb, (len(bins), R, C, 1, 1), dtype=jnp.float32) / np.sqrt(C)
    a_branch = jnp.array([0.25, 0.2, 0.3, 0.15], dtype=jnp.float32)
    w_fuse = jax.random.normal(
        k_wf, (C, Ctot, 3, 3), dtype=jnp.float32) / np.sqrt(Ctot * 9)
    a_fuse = jnp.float32(0.25)

    out = jax.block_until_ready(
        ppm1_forward(x, w_branch, a_branch, w_fuse, a_fuse, bins))
    ref = jax.block_until_ready(
        ppm1_reference(x, w_branch, a_branch, w_fuse, a_fuse, bins))

    assert out.shape == (N, C, H, W)
    err = float(jnp.max(jnp.abs(out - ref)))
    assert jnp.allclose(out, ref, rtol=2e-3, atol=2e-3), f"max abs err {err}"
    print("KERNEL_OK")
</pallas_src>

<mosaic_0001>
module attributes {stable_mosaic.version = 11 : i64} {
  func.func @ppm1_kernel(%arg0: i32, %arg1: memref<1x4x256xf32, #tpu.memory_space<vmem>>, %arg2: memref<4x64x256xf32, #tpu.memory_space<vmem>>, %arg3: memref<8x4xf32, #tpu.memory_space<vmem>>, %arg4: memref<4x64x256xf32, #tpu.memory_space<vmem>>, %arg5: memref<4x108xf32, #tpu.memory_space<vmem>>, %arg6: memref<9x1x256xf32, #tpu.memory_space<vmem>>, %arg7: memref<5xf32, #tpu.memory_space<smem>>, %arg8: memref<1x4x256xf32, #tpu.memory_space<vmem>>) attributes {dimension_semantics = [#tpu.dimension_semantics<parallel>], iteration_bounds = array<i64: 2>, scalar_prefetch = 0 : i64, scratch_operands = 0 : i64, tpu.core_type = #tpu.core_type<tc>, window_params = [{transform_indices = @transform_0, window_bounds = array<i64: 1, 4, 256>}, {pipeline_mode = #tpu.pipeline_mode<synchronous>, transform_indices = @transform_1, window_bounds = array<i64: 4, 64, 256>}, {pipeline_mode = #tpu.pipeline_mode<synchronous>, transform_indices = @transform_2, window_bounds = array<i64: 8, 4>}, {pipeline_mode = #tpu.pipeline_mode<synchronous>, transform_indices = @transform_3, window_bounds = array<i64: 4, 64, 256>}, {pipeline_mode = #tpu.pipeline_mode<synchronous>, transform_indices = @transform_4, window_bounds = array<i64: 4, 108>}, {pipeline_mode = #tpu.pipeline_mode<synchronous>, transform_indices = @transform_5, window_bounds = array<i64: 9, 1, 256>}, {transform_indices = @transform_6, window_bounds = array<i64: 5>}, {transform_indices = @transform_7, window_bounds = array<i64: 1, 4, 256>}]} {
    %c0 = arith.constant 0 : index
    %c0_0 = arith.constant 0 : index
    %c0_1 = arith.constant 0 : index
    %0 = vector.load %arg1[%c0, %c0_0, %c0_1] : memref<1x4x256xf32, #tpu.memory_space<vmem>>, vector<1x4x256xf32>
    %1 = vector.shape_cast %0 : vector<1x4x256xf32> to vector<4x256xf32>
    %c0_2 = arith.constant 0 : index
    %c0_3 = arith.constant 0 : index
    %2 = vector.load %arg3[%c0_2, %c0_3] : memref<8x4xf32, #tpu.memory_space<vmem>>, vector<8x4xf32>
    %cst = arith.constant dense<0.000000e+00> : vector<8x256xf32>
    %3 = tpu.matmul %2, %1, %cst {dimension_numbers = #tpu.dot_dimension_numbers<[1], [0], [0], [1], [0, 0, 1, 1], [], []>} : vector<8x4xf32>, vector<4x256xf32>, vector<8x256xf32> -> vector<8x256xf32>
    %4 = vector.extract_strided_slice %3 {offsets = [0, 0], sizes = [2, 256], strides = [1, 1]} : vector<8x256xf32> to vector<2x256xf32>
    %c0_4 = arith.constant 0 : index
    %c0_5 = arith.constant 0 : index
    %c0_6 = arith.constant 0 : index
    %5 = vector.load %arg2[%c0_4, %c0_5, %c0_6] : memref<4x64x256xf32, #tpu.memory_space<vmem>>, vector<1x64x256xf32>
    %6 = vector.shape_cast %5 : vector<1x64x256xf32> to vector<64x256xf32>
    %cst_7 = arith.constant dense<0.000000e+00> : vector<2x64xf32>
    %7 = tpu.matmul %4, %6, %cst_7 {dimension_numbers = #tpu.dot_dimension_numbers<[1], [1], [0], [0], [0, 0, 1, 0], [], []>} : vector<2x256xf32>, vector<64x256xf32>, vector<2x64xf32> -> vector<2x64xf32>
    %c0_8 = arith.constant 0 : index
    %8 = memref.load %arg7[%c0_8] : memref<5xf32, #tpu.memory_space<smem>>
    %cst_9 = arith.constant 0.000000e+00 : f32
    %9 = vector.broadcast %cst_9 : f32 to vector<2x64xf32>
    %10 = arith.cmpf ogt, %7, %9 : vector<2x64xf32>
    %11 = vector.broadcast %8 : f32 to vector<2x64xf32>
    %12 = arith.mulf %11, %7 : vector<2x64xf32>
    %13 = arith.select %10, %7, %12 : vector<2x64xi1>, vector<2x64xf32>
    %c0_10 = arith.constant 0 : index
    %c0_11 = arith.constant 0 : index
    %c0_12 = arith.constant 0 : index
    %14 = vector.load %arg4[%c0_10, %c0_11, %c0_12] : memref<4x64x256xf32, #tpu.memory_space<vmem>>, vector<1x64x256xf32>
    %15 = vector.shape_cast %14 : vector<1x64x256xf32> to vector<64x256xf32>
    %cst_13 = arith.constant dense<0.000000e+00> : vector<2x256xf32>
    %16 = tpu.matmul %13, %15, %cst_13 {dimension_numbers = #tpu.dot_dimension_numbers<[1], [0], [0], [1], [0, 0, 1, 1], [], []>} : vector<2x64xf32>, vector<64x256xf32>, vector<2x256xf32> -> vector<2x256xf32>
    %17 = vector.extract_strided_slice %3 {offsets = [2, 0], sizes = [2, 256], strides = [1, 1]} : vector<8x256xf32> to vector<2x256xf32>
    %c1 = arith.constant 1 : index
    %c0_14 = arith.constant 0 : index
    %c0_15 = arith.constant 0 : index
    %18 = vector.load %arg2[%c1, %c0_14, %c0_15] : memref<4x64x256xf32, #tpu.memory_space<vmem>>, vector<1x64x256xf32>
    %19 = vector.shape_cast %18 : vector<1x64x256xf32> to vector<64x256xf32>
    %cst_16 = arith.constant dense<0.000000e+00> : vector<2x64xf32>
    %20 = tpu.matmul %17, %19, %cst_16 {dimension_numbers = #tpu.dot_dimension_numbers<[1], [1], [0], [0], [0, 0, 1, 0], [], []>} : vector<2x256xf32>, vector<64x256xf32>, vector<2x64xf32> -> vector<2x64xf32>
    %c1_17 = arith.constant 1 : index
    %21 = memref.load %arg7[%c1_17] : memref<5xf32, #tpu.memory_space<smem>>
    %cst_18 = arith.constant 0.000000e+00 : f32
    %22 = vector.broadcast %cst_18 : f32 to vector<2x64xf32>
    %23 = arith.cmpf ogt, %20, %22 : vector<2x64xf32>
    %24 = vector.broadcast %21 : f32 to vector<2x64xf32>
    %25 = arith.mulf %24, %20 : vector<2x64xf32>
    %26 = arith.select %23, %20, %25 : vector<2x64xi1>, vector<2x64xf32>
    %c1_19 = arith.constant 1 : index
    %c0_20 = arith.constant 0 : index
    %c0_21 = arith.constant 0 : index
    %27 = vector.load %arg4[%c1_19, %c0_20, %c0_21] : memref<4x64x256xf32, #tpu.memory_space<vmem>>, vector<1x64x256xf32>
    %28 = vector.shape_cast %27 : vector<1x64x256xf32> to vector<64x256xf32>
    %cst_22 = arith.constant dense<0.000000e+00> : vector<2x256xf32>
    %29 = tpu.matmul %26, %28, %cst_22 {dimension_numbers = #tpu.dot_dimension_numbers<[1], [0], [0], [1], [0, 0, 1, 1], [], []>} : vector<2x64xf32>, vector<64x256xf32>, vector<2x256xf32> -> vector<2x256xf32>
    %30 = vector.extract_strided_slice %3 {offsets = [4, 0], sizes = [2, 256], strides = [1, 1]} : vector<8x256xf32> to vector<2x256xf32>
    %c2 = arith.constant 2 : index
    %c0_23 = arith.constant 0 : index
    %c0_24 = arith.constant 0 : index
    %31 = vector.load %arg2[%c2, %c0_23, %c0_24] : memref<4x64x256xf32, #tpu.memory_space<vmem>>, vector<1x64x256xf32>
    %32 = vector.shape_cast %31 : vector<1x64x256xf32> to vector<64x256xf32>
    %cst_25 = arith.constant dense<0.000000e+00> : vector<2x64xf32>
    %33 = tpu.matmul %30, %32, %cst_25 {dimension_numbers = #tpu.dot_dimension_numbers<[1], [1], [0], [0], [0, 0, 1, 0], [], []>} : vector<2x256xf32>, vector<64x256xf32>, vector<2x64xf32> -> vector<2x64xf32>
    %c2_26 = arith.constant 2 : index
    %34 = memref.load %arg7[%c2_26] : memref<5xf32, #tpu.memory_space<smem>>
    %cst_27 = arith.constant 0.000000e+00 : f32
    %35 = vector.broadcast %cst_27 : f32 to vector<2x64xf32>
    %36 = arith.cmpf ogt, %33, %35 : vector<2x64xf32>
    %37 = vector.broadcast %34 : f32 to vector<2x64xf32>
    %38 = arith.mulf %37, %33 : vector<2x64xf32>
    %39 = arith.select %36, %33, %38 : vector<2x64xi1>, vector<2x64xf32>
    %c2_28 = arith.constant 2 : index
    %c0_29 = arith.constant 0 : index
    %c0_30 = arith.constant 0 : index
    %40 = vector.load %arg4[%c2_28, %c0_29, %c0_30] : memref<4x64x256xf32, #tpu.memory_space<vmem>>, vector<1x64x256xf32>
    %41 = vector.shape_cast %40 : vector<1x64x256xf32> to vector<64x256xf32>
    %cst_31 = arith.constant dense<0.000000e+00> : vector<2x256xf32>
    %42 = tpu.matmul %39, %41, %cst_31 {dimension_numbers = #tpu.dot_dimension_numbers<[1], [0], [0], [1], [0, 0, 1, 1], [], []>} : vector<2x64xf32>, vector<64x256xf32>, vector<2x256xf32> -> vector<2x256xf32>
    %43 = vector.extract_strided_slice %3 {offsets = [6, 0], sizes = [2, 256], strides = [1, 1]} : vector<8x256xf32> to vector<2x256xf32>
    %c3 = arith.constant 3 : index
    %c0_32 = arith.constant 0 : index
    %c0_33 = arith.constant 0 : index
    %44 = vector.load %arg2[%c3, %c0_32, %c0_33] : memref<4x64x256xf32, #tpu.memory_space<vmem>>, vector<1x64x256xf32>
    %45 = vector.shape_cast %44 : vector<1x64x256xf32> to vector<64x256xf32>
    %cst_34 = arith.constant dense<0.000000e+00> : vector<2x64xf32>
    %46 = tpu.matmul %43, %45, %cst_34 {dimension_numbers = #tpu.dot_dimension_numbers<[1], [1], [0], [0], [0, 0, 1, 0], [], []>} : vector<2x256xf32>, vector<64x256xf32>, vector<2x64xf32> -> vector<2x64xf32>
    %c3_35 = arith.constant 3 : index
    %47 = memref.load %arg7[%c3_35] : memref<5xf32, #tpu.memory_space<smem>>
    %cst_36 = arith.constant 0.000000e+00 : f32
    %48 = vector.broadcast %cst_36 : f32 to vector<2x64xf32>
    %49 = arith.cmpf ogt, %46, %48 : vector<2x64xf32>
    %50 = vector.broadcast %47 : f32 to vector<2x64xf32>
    %51 = arith.mulf %50, %46 : vector<2x64xf32>
    %52 = arith.select %49, %46, %51 : vector<2x64xi1>, vector<2x64xf32>
    %c3_37 = arith.constant 3 : index
    %c0_38 = arith.constant 0 : index
    %c0_39 = arith.constant 0 : index
    %53 = vector.load %arg4[%c3_37, %c0_38, %c0_39] : memref<4x64x256xf32, #tpu.memory_space<vmem>>, vector<1x64x256xf32>
    %54 = vector.shape_cast %53 : vector<1x64x256xf32> to vector<64x256xf32>
    %cst_40 = arith.constant dense<0.000000e+00> : vector<2x256xf32>
    %55 = tpu.matmul %52, %54, %cst_40 {dimension_numbers = #tpu.dot_dimension_numbers<[1], [0], [0], [1], [0, 0, 1, 1], [], []>} : vector<2x64xf32>, vector<64x256xf32>, vector<2x256xf32> -> vector<2x256xf32>
    %56 = tpu.concatenate %1, %16, %29, %42, %55 in 0 : vector<4x256xf32>, vector<2x256xf32>, vector<2x256xf32>, vector<2x256xf32>, vector<2x256xf32> -> vector<12x256xf32>
    %c17_i32 = arith.constant 17 : i32
    %57 = tpu.dynamic_rotate %56 by %c17_i32 dim 1 : vector<12x256xf32>, i32 -> vector<12x256xf32>
    %c0_41 = arith.constant 0 : index
    %c0_42 = arith.constant 0 : index
    %c0_43 = arith.constant 0 : index
    %58 = vector.load %arg6[%c0_41, %c0_42, %c0_43] : memref<9x1x256xf32, #tpu.memory_space<vmem>>, vector<1x1x256xf32>
    %59 = vector.shape_cast %58 : vector<1x1x256xf32> to vector<1x256xf32>
    %60 = vector.broadcast %59 : vector<1x256xf32> to vector<12x256xf32>
    %61 = arith.mulf %57, %60 : vector<12x256xf32>
    %c16_i32 = arith.constant 16 : i32
    %62 = tpu.dynamic_rotate %56 by %c16_i32 dim 1 : vector<12x256xf32>, i32 -> vector<12x256xf32>
    %c1_44 = arith.constant 1 : index
    %c0_45 = arith.constant 0 : index
    %c0_46 = arith.constant 0 : index
    %63 = vector.load %arg6[%c1_44, %c0_45, %c0_46] : memref<9x1x256xf32, #tpu.memory_space<vmem>>, vector<1x1x256xf32>
    %64 = vector.shape_cast %63 : vector<1x1x256xf32> to vector<1x256xf32>
    %65 = vector.broadcast %64 : vector<1x256xf32> to vector<12x256xf32>
    %66 = arith.mulf %62, %65 : vector<12x256xf32>
    %c15_i32 = arith.constant 15 : i32
    %67 = tpu.dynamic_rotate %56 by %c15_i32 dim 1 : vector<12x256xf32>, i32 -> vector<12x256xf32>
    %c2_47 = arith.constant 2 : index
    %c0_48 = arith.constant 0 : index
    %c0_49 = arith.constant 0 : index
    %68 = vector.load %arg6[%c2_47, %c0_48, %c0_49] : memref<9x1x256xf32, #tpu.memory_space<vmem>>, vector<1x1x256xf32>
    %69 = vector.shape_cast %68 : vector<1x1x256xf32> to vector<1x256xf32>
    %70 = vector.broadcast %69 : vector<1x256xf32> to vector<12x256xf32>
    %71 = arith.mulf %67, %70 : vector<12x256xf32>
    %c1_i32 = arith.constant 1 : i32
    %72 = tpu.dynamic_rotate %56 by %c1_i32 dim 1 : vector<12x256xf32>, i32 -> vector<12x256xf32>
    %c3_50 = arith.constant 3 : index
    %c0_51 = arith.constant 0 : index
    %c0_52 = arith.constant 0 : index
    %73 = vector.load %arg6[%c3_50, %c0_51, %c0_52] : memref<9x1x256xf32, #tpu.memory_space<vmem>>, vector<1x1x256xf32>
    %74 = vector.shape_cast %73 : vector<1x1x256xf32> to vector<1x256xf32>
    %75 = vector.broadcast %74 : vector<1x256xf32> to vector<12x256xf32>
    %76 = arith.mulf %72, %75 : vector<12x256xf32>
    %c255_i32 = arith.constant 255 : i32
    %77 = tpu.dynamic_rotate %56 by %c255_i32 dim 1 : vector<12x256xf32>, i32 -> vector<12x256xf32>
    %c5 = arith.constant 5 : index
    %c0_53 = arith.constant 0 : index
    %c0_54 = arith.constant 0 : index
    %78 = vector.load %arg6[%c5, %c0_53, %c0_54] : memref<9x1x256xf32, #tpu.memory_space<vmem>>, vector<1x1x256xf32>
    %79 = vector.shape_cast %78 : vector<1x1x256xf32> to vector<1x256xf32>
    %80 = vector.broadcast %79 : vector<1x256xf32> to vector<12x256xf32>
    %81 = arith.mulf %77, %80 : vector<12x256xf32>
    %c241_i32 = arith.constant 241 : i32
    %82 = tpu.dynamic_rotate %56 by %c241_i32 dim 1 : vector<12x256xf32>, i32 -> vector<12x256xf32>
    %c6 = arith.constant 6 : index
    %c0_55 = arith.constant 0 : index
    %c0_56 = arith.constant 0 : index
    %83 = vector.load %arg6[%c6, %c0_55, %c0_56] : memref<9x1x256xf32, #tpu.memory_space<vmem>>, vector<1x1x256xf32>
    %84 = vector.shape_cast %83 : vector<1x1x256xf32> to vector<1x256xf32>
    %85 = vector.broadcast %84 : vector<1x256xf32> to vector<12x256xf32>
    %86 = arith.mulf %82, %85 : vector<12x256xf32>
    %c240_i32 = arith.constant 240 : i32
    %87 = tpu.dynamic_rotate %56 by %c240_i32 dim 1 : vector<12x256xf32>, i32 -> vector<12x256xf32>
    %c7 = arith.constant 7 : index
    %c0_57 = arith.constant 0 : index
    %c0_58 = arith.constant 0 : index
    %88 = vector.load %arg6[%c7, %c0_57, %c0_58] : memref<9x1x256xf32, #tpu.memory_space<vmem>>, vector<1x1x256xf32>
    %89 = vector.shape_cast %88 : vector<1x1x256xf32> to vector<1x256xf32>
    %90 = vector.broadcast %89 : vector<1x256xf32> to vector<12x256xf32>
    %91 = arith.mulf %87, %90 : vector<12x256xf32>
    %c239_i32 = arith.constant 239 : i32
    %92 = tpu.dynamic_rotate %56 by %c239_i32 dim 1 : vector<12x256xf32>, i32 -> vector<12x256xf32>
    %c8 = arith.constant 8 : index
    %c0_59 = arith.constant 0 : index
    %c0_60 = arith.constant 0 : index
    %93 = vector.load %arg6[%c8, %c0_59, %c0_60] : memref<9x1x256xf32, #tpu.memory_space<vmem>>, vector<1x1x256xf32>
    %94 = vector.shape_cast %93 : vector<1x1x256xf32> to vector<1x256xf32>
    %95 = vector.broadcast %94 : vector<1x256xf32> to vector<12x256xf32>
    %96 = arith.mulf %92, %95 : vector<12x256xf32>
    %97 = tpu.concatenate %61, %66, %71, %76, %56, %81, %86, %91, %96 in 0 : vector<12x256xf32>, vector<12x256xf32>, vector<12x256xf32>, vector<12x256xf32>, vector<12x256xf32>, vector<12x256xf32>, vector<12x256xf32>, vector<12x256xf32>, vector<12x256xf32> -> vector<108x256xf32>
    %c0_61 = arith.constant 0 : index
    %c0_62 = arith.constant 0 : index
    %98 = vector.load %arg5[%c0_61, %c0_62] : memref<4x108xf32, #tpu.memory_space<vmem>>, vector<4x108xf32>
    %cst_63 = arith.constant dense<0.000000e+00> : vector<4x256xf32>
    %99 = tpu.matmul %98, %97, %cst_63 {dimension_numbers = #tpu.dot_dimension_numbers<[1], [0], [0], [1], [0, 0, 1, 1], [], []>} : vector<4x108xf32>, vector<108x256xf32>, vector<4x256xf32> -> vector<4x256xf32>
    %c4 = arith.constant 4 : index
    %100 = memref.load %arg7[%c4] : memref<5xf32, #tpu.memory_space<smem>>
    %cst_64 = arith.constant 0.000000e+00 : f32
    %101 = vector.broadcast %cst_64 : f32 to vector<4x256xf32>
    %102 = arith.cmpf ogt, %99, %101 : vector<4x256xf32>
    %103 = vector.broadcast %100 : f32 to vector<4x256xf32>
    %104 = arith.mulf %103, %99 : vector<4x256xf32>
    %105 = arith.select %102, %99, %104 : vector<4x256xi1>, vector<4x256xf32>
    %106 = vector.shape_cast %105 : vector<4x256xf32> to vector<1x4x256xf32>
    %c0_65 = arith.constant 0 : index
    %c0_66 = arith.constant 0 : index
    %c0_67 = arith.constant 0 : index
    %107 = vector.load %arg8[%c0_65, %c0_66, %c0_67] : memref<1x4x256xf32, #tpu.memory_space<vmem>>, vector<1x4x256xf32>
    tpu.vector_store %arg8[%c0_65, %c0_66, %c0_67], %106 {strides = array<i32>} : memref<1x4x256xf32, #tpu.memory_space<vmem>>, vector<1x4x256xf32>,
    return
  }
  func.func @transform_0(%arg0: i32) -> (i32, i32, i32) {
    %c0_i32 = arith.constant 0 : i32
    %c0_i32_0 = arith.constant 0 : i32
    %c0_i32_1 = arith.constant 0 : i32
    return %arg0, %c0_i32, %c0_i32_0 : i32, i32, i32
  }
  func.func @transform_1(%arg0: i32) -> (i32, i32, i32) {
    %c0_i32 = arith.constant 0 : i32
    %c0_i32_0 = arith.constant 0 : i32
    %c0_i32_1 = arith.constant 0 : i32
    %c0_i32_2 = arith.constant 0 : i32
    return %c0_i32, %c0_i32_0, %c0_i32_1 : i32, i32, i32
  }
  func.func @transform_2(%arg0: i32) -> (i32, i32) {
    %c0_i32 = arith.constant 0 : i32
    %c0_i32_0 = arith.constant 0 : i32
    %c0_i32_1 = arith.constant 0 : i32
    return %c0_i32, %c0_i32_0 : i32, i32
  }
  func.func @transform_3(%arg0: i32) -> (i32, i32, i32) {
    %c0_i32 = arith.constant 0 : i32
    %c0_i32_0 = arith.constant 0 : i32
    %c0_i32_1 = arith.constant 0 : i32
    %c0_i32_2 = arith.constant 0 : i32
    return %c0_i32, %c0_i32_0, %c0_i32_1 : i32, i32, i32
  }
  func.func @transform_4(%arg0: i32) -> (i32, i32) {
    %c0_i32 = arith.constant 0 : i32
    %c0_i32_0 = arith.constant 0 : i32
    %c0_i32_1 = arith.constant 0 : i32
    return %c0_i32, %c0_i32_0 : i32, i32
  }
  func.func @transform_5(%arg0: i32) -> (i32, i32, i32) {
    %c0_i32 = arith.constant 0 : i32
    %c0_i32_0 = arith.constant 0 : i32
    %c0_i32_1 = arith.constant 0 : i32
    %c0_i32_2 = arith.constant 0 : i32
    return %c0_i32, %c0_i32_0, %c0_i32_1 : i32, i32, i32
  }
  func.func @transform_6(%arg0: i32) -> i32 {
    %c0_i32 = arith.constant 0 : i32
    %c0_i32_0 = arith.constant 0 : i32
    return %c0_i32 : i32
  }
  func.func @transform_7(%arg0: i32) -> (i32, i32, i32) {
    %c0_i32 = arith.constant 0 : i32
    %c0_i32_0 = arith.constant 0 : i32
    %c0_i32_1 = arith.constant 0 : i32
    return %arg0, %c0_i32, %c0_i32_0 : i32, i32, i32
  }
}

</mosaic_0001>

<bundles_post_ra>
// kernel: tpu_custom_call.1
= control target key start
LH: loop header
LB: loop body
LE: loop exit
PB: predicated region body
PF: predicated region fallthrough
CT: control target
= control target key end

     0   :  { %s2220_s0 = inlined_call_operand.hbm [shape: f32[2,4,256], index: 0, kind: input, shape index: {}]   ;;  %s2221_s1 = inlined_call_operand.hbm [shape: f32[4,64,256], index: 1, kind: input, shape index: {}]   ;;  %s2222_s2 = inlined_call_operand.vmem [shape: f32[8,4], index: 2, kind: input, shape index: {}]   ;;  %s2223_s3 = inlined_call_operand.hbm [shape: f32[4,64,256], index: 3, kind: input, shape index: {}]   ;;  %s2224_s4 = inlined_call_operand.vmem [shape: f32[4,108], index: 4, kind: input, shape index: {}]   ;;  %s2225_s5 = inlined_call_operand.hbm [shape: f32[9,1,256], index: 5, kind: input, shape index: {}]   ;;  %s2226_s6 = inlined_call_operand.vmem [shape: f32[5], index: 6, kind: input, shape index: {}]   ;;  %s2227_s7 = inlined_call_operand.hbm [shape: f32[2,4,256], index: 7, kind: output, shape index: {}]  }
   0x1   :  { %2228 = sst [smem:[#allocation18_spill]] %s2221_s1 }
   0x2   :  { %2229 = sst [smem:[#allocation19_spill]] %s2223_s3 }
   0x3   :  { %12 = vsyncpa [#allocation3], 0 }
   0x4   :  { %14 = vsyncpa [#allocation3 + $0x1], 0 }
   0x5   :  { %15 = vsyncpa [#allocation7], 0 }
   0x6   :  { %16 = vsyncpa [#allocation10], 0 }
   0x7   :  { %17 = vsyncpa [#allocation5], 0 }
   0x8   :  { %18 = vsyncpa [#allocation4], 0 }
   0x9   :  { %20 = vsyncpa [#allocation4 + $0x1], 0  ;;  %s1812_s24 = smov 0   ;;  %s1814_s25 = smov 0  }
   0xa   :  { %s1816_s26 = smov 0   ;;  %s1818_s27 = smov 0  }
   0xb LB: > { %s2230_s1 = sld [smem:[#allocation18_spill]]  ;;  %s1836_s8 = sadd.s32 4294967295, %s1754_s27   ;;  %s1754_s27 = sphi %s1818_s27, %s2243_s27   ;;  %s1750_s26 = sphi %s1816_s26, %s2242_s26   ;;  %s1746_s25 = sphi %s1814_s25, %s2241_s25   ;;  %s1742_s24 = sphi %s1812_s24, %s2240_s24  }
   0xc   : > { %p1399_p0 = scmp.ge.s32.totalorder %s1754_s27, 1  ;;  %p47_p1 = scmp.eq.s32.totalorder %s1836_s8, 0 }
   0xd   : > { %p209_p2 = scmp.lt.s32.totalorder %s1754_s27, 3  ;;  %s1756_s10 = smov [#allocation6]  }
   0xe   : > { %s222_s11 = sshll.u32 %s1756_s10, 4  ;;  %s2232_s3 = sld [smem:[#allocation19_spill]]  ;;  %s223_s11 = int_to_ptr.vmem [resolvable:$true] %s222_s11 }
   0xf   : > { %p1841_p3 = pnand %p1399_p0, %p209_p2  ;;  %s254_s18 = sshll.u32 %s2225_s5, 4  ;;  %s255_s18 = int_to_ptr.hbm [resolvable:$true] %s254_s18 }
  0x10   : > { %s1757_s19 = smov [#allocation8]   ;;  %s1758_s21 = smov 256  }
  0x11   : > { %s220_s30 = sshll.u32 %s2230_s1, 4  ;;  %p1462_p4 = pneg %p1841_p3  ;;  %s221_s30 = int_to_ptr.hbm [resolvable:$true] %s220_s30 }
  0x12   : > { %s239_s20 = sshll.u32 %s1757_s19, 4  ;;  %s1759_s22 = smov 16   ;;  %s240_s20 = int_to_ptr.vmem [resolvable:$true] %s239_s20 }
  0x13   : > { %p1853_p6 = pnand %p1462_p4, %p47_p1  ;;  %s1760_s23 = smov [#allocation9]  }
  0x14   : > { %s237_s14 = sshll.u32 %s2232_s3, 4  ;;  %s256_s28 = sshll.u32 %s1760_s23, 4  ;;  %s238_s14 = int_to_ptr.hbm [resolvable:$true] %s237_s14  ;;  %s257_s28 = int_to_ptr.vmem [resolvable:$true] %s256_s28 }
  0x15   : > { %1465 = dma.hbm_to_vmem [thread:$0]  (!%p1853_p6), %s221_s30, 8192, %s223_s11, [#allocation7], %s1758_s21, %s1758_s21, %s1759_s22  }
  0x16   : > { %1468 = dma.hbm_to_vmem [thread:$0]  (!%p1853_p6), %s238_s14, 8192, %s240_s20, [#allocation7], %s1758_s21, %s1758_s21, %s1759_s22  }
  0x17   : > { %s269_s12 = sshll.u32 %s2226_s6, 4  ;;  %s1761_s30 = smov 32   ;;  %s270_s12 = int_to_ptr.vmem [resolvable:$true] %s269_s12 }
  0x18   : > { %s1762_s11 = smov 2   ;;  %s1763_s13 = smov [#allocation11]  }
  0x19   : > { %1471 = dma.hbm_to_vmem [thread:$0]  (!%p1853_p6), %s255_s18, 288, %s257_s28, [#allocation10], %s1761_s30, %s1761_s30, %s1762_s11  }
  0x1a   : > { %1474 = dma.vmem_to_smem (!%p1853_p6), %s270_s12, 16, %s1763_s13, [#allocation5]  }
  0x1b   : > { %s1398_s14 = sadd.s32 4294967294, %s1754_s27   ;;  %s1873_s16 = sadd.s32 1, %s1754_s27  }
  0x1c   : > { %s30_s17 = ssub.s32 %s1754_s27, %s1873_s16  ;;  %s33_s19 = sadd.s32 1, %s1750_s26 }
  0x1d   : > { %p31_p7 = scmp.eq.s32.totalorder %s30_s17, 0  ;;  %p40_p8 = scmp.ne.s32.totalorder %s1750_s26, %s1746_s25 }
  0x1e   : > { %p41_p9 = scmp.eq.s32.totalorder %s1754_s27, 0  ;;  %p46_p10 = scmp.ne.s32.totalorder %s1746_s25, %s1742_s24 }
  0x1f   : > { %s1884_s20 = scalar_select %p31_p7, %s1750_s26, %s33_s19  }
  0x20   : > { %p1886_p11 = por %p41_p9, %p40_p8  ;;  %p1892_p12 = por %p47_p1, %p46_p10 }
  0x21   : > { %p196_p13 = scmp.eq.s32.totalorder %s1836_s8, 1  ;;  %p202_p0 = scmp.eq.s32.totalorder %s1398_s14, 1 }
  0x22   : > { %p1487_p2 = scmp.lt.s32.totalorder %s1754_s27, 2  ;;  %s280_s21 = sand.u32 1, %s1750_s26  }
  0x23   : > { %p1899_p4 = por %p196_p13, %p40_p8  ;;  %p1903_p6 = por %p202_p0, %p46_p10 }
  0x24   : > { %s1405_s28 = sshll.u32 %s280_s21, 3  ;;  %s1440_s29 = sshll.u32 %s1754_s27, 3 }
  0x25   : > { %s289_s30 = scalar_lea.hbm %s2220_s0, %s1440_s29  ;;  %s284_s11 = scalar_lea.vmem [#allocation2], %s1405_s28 }
  0x26   : > { %s293_s13 = sshll.u32 %s284_s11, 4  ;;  %s291_s17 = sshll.u32 %s289_s30, 4  ;;  %s294_s13 = int_to_ptr.vmem [resolvable:$true] %s293_s13  ;;  %s292_s17 = int_to_ptr.hbm [resolvable:$true] %s291_s17 }
  0x27   : > { %p1913_p7 = pnand %p1487_p2, %p1886_p11  ;;  %s281_s19 = scalar_lea.sflag [#allocation3], %s280_s21 }
  0x28   : > { %s1646_s1 = sshra.s32 %s292_s17, 4  ;;  %s1653_s10 = scalar_lea.hbm %s2220_s0, 16  ;;  %s1647_s1 = int_to_ptr.hbm [resolvable:$true] %s1646_s1 }
  0x29   : > { %s1648_s3 = scalar_lea.hbm %s1647_s1, 8  ;;  %p1650_p9 = pneg %p1913_p7 }
  0x2a   : > { %p1649_p8 = scmp.ne.s32.totalorder %s1647_s1, %s1648_s3  ;;  %p1654_p11 = scmp.lt.s32.totalorder %s1647_s1, %s2220_s0 }
  0x2b   : > { %p1655_p0 = scmp.lt.s32.totalorder %s1653_s10, %s1648_s3 }
  0x2c   : > { %p1651_p10 = pnand %p1650_p9, %p1649_p8 }
  0x2d   : > { %p1656_p2 = por %p1655_p0, %p1654_p11 }
  0x2e   : > { %p1652_p13 = pneg %p1651_p10 }
  0x30   : > { %p1657_p5 = pnand %p1656_p2, %p1652_p13 }
  0x32   : > { %1660 = shalt.err (!%p1657_p5)
}
  0x33   : > { %1478 = dma.hbm_to_vmem [thread:$0]  (!%p1913_p7), %s292_s17, 128, %s294_s13, %s281_s19  }
  0x34   : > { %302 = sbr.rel (%p1841_p3) target bundleno = 1083 (0x43b), region = 48  ;;  %s1930_s21 = sand.u32 (!%p1841_p3), 1, %s1746_s25  }
  0x35   : > { %s1409_s30 = sshll.u32 (!%p1841_p3), %s1930_s21, 3  ;;  %s305_s11 = scalar_lea.sflag (!%p1841_p3), [#allocation3], %s1930_s21 }
  0x36   : > { %s308_s1 = scalar_lea.vmem (!%p1841_p3), [#allocation2], %s1409_s30 }
  0x39   : > { %1721 = dma.done.wait (%p1892_p12), %s305_s11, 128  }
  0x3a   : > { %1723 = vsyncadd (%p1892_p12), %s305_s11, 4294967168 }
  0x3b   : > { %1725 = dma.done.wait (%p47_p1), [#allocation7], 16384  }
  0x3c   : > { %1727 = vsyncadd (%p47_p1), [#allocation7], 4294950912 }
  0x3d   : > { %1729 = dma.done.wait (%p47_p1), [#allocation10], 288  }
  0x3e   : > { %1731 = vsyncadd (%p47_p1), [#allocation10], 4294967008 }
  0x3f   : > { %1733 = dma.done.wait (%p47_p1), [#allocation5], 16  }
  0x40   : > { %1735 = vsyncadd (%p47_p1), [#allocation5], 4294967280 }
  0x41   : > { %334 = sfence }
  0x42   : > { %v361_v0 = vld [vmem:[%s308_s1] sm:$0xff]  ;;  %vm371_vm0 = vcmask 1043456   ;;  %v362_v1 = vld [vmem:[%s2222_s2] sm:$0xff]  ;;  %vm367_vm1 = vcmask 31744   ;;  %v428_v6 = vld [vmem:[#allocation6 + $0x60] sm:$0xff]  ;;  %s472_s15 = sld [smem:[#allocation11]] }
  0x43   : > { %364 = vst [vmem:[#allocation1] ss:$2 sm:$0xff] %v361_v0  ;;  %v430_v2 = vld [vmem:[#allocation6 + $0x70] sm:$0xff]  ;;  %v431_v3 = vld [vmem:[#allocation6 + $0x78] sm:$0xff]  ;;  %v429_v7 = vld [vmem:[#allocation6 + $0x68] sm:$0xff]  ;;  %vm493_vm3 = vcmask 523264  }
  0x44   : > { %v426_v8 = vld [vmem:[#allocation6 + $0x50] sm:$0xff]  ;;  %v427_v9 = vld [vmem:[#allocation6 + $0x58] sm:$0xff]  ;;  %v424_v10 = vld [vmem:[#allocation6 + $0x40] sm:$0xff]  ;;  %s1421_s13 = sld [smem:[#allocation11 + $0x1]]  ;;  %vm942_vm6 = vcmask 1045504   ;;  %s1764_s14 = smov 112  }
  0x45   : > { %v425_v11 = vld [vmem:[#allocation6 + $0x48] sm:$0xff]  ;;  %v422_v12 = vld [vmem:[#allocation6 + $0x30] sm:$0xff]  ;;  %v423_v13 = vld [vmem:[#allocation6 + $0x38] sm:$0xff]  ;;  %s1424_s17 = sld [smem:[#allocation11 + $0x2]]  ;;  %s1765_s19 = smov 111   ;;  %vm945_vm8 = vcmask 1041408  }
  0x46   : > { %v420_v14 = vld [vmem:[#allocation6 + $0x20] sm:$0xff]  ;;  %v421_v15 = vld [vmem:[#allocation6 + $0x28] sm:$0xff]  ;;  %v418_v16 = vld [vmem:[#allocation6 + $0x10] sm:$0xff]  ;;  %s1766_s28 = smov 113   ;;  %s1767_s29 = smov 127  }
  0x47   : > { %v419_v17 = vld [vmem:[#allocation6 + $0x18] sm:$0xff]  ;;  %v416_v18 = vld [vmem:[#allocation6] sm:$0xff]  ;;  %v417_v19 = vld [vmem:[#allocation6 + $0x8] sm:$0xff]  ;;  %s1768_s10 = smov 15   ;;  %s1427_s12 = sld [smem:[#allocation11 + $0x3]] }
  0x48   : > { %v680_v20 = vld [vmem:[#allocation6 + $0x170] sm:$0xff]  ;;  %v681_v21 = vld [vmem:[#allocation6 + $0x178] sm:$0xff]  ;;  %v678_v22 = vld [vmem:[#allocation6 + $0x160] sm:$0xff]  ;;  %s1769_s18 = smov 1   ;;  %s1770_s11 = smov 16  }
  0x49   : > { %v679_v23 = vld [vmem:[#allocation6 + $0x168] sm:$0xff]  ;;  %v676_v24 = vld [vmem:[#allocation6 + $0x150] sm:$0xff]  ;;  %v677_v25 = vld [vmem:[#allocation6 + $0x158] sm:$0xff]  ;;  %s1771_s1 = smov 17  }
  0x4a   : > { %v365_v4 = vld.sshfl [vmem:[#allocation1] sm:$0xff pattern:$0x75316420]  ;;  %v366_v5 = vld.sshfl [vmem:[#allocation1 + $0x8] sm:$0xff pattern:$0x75316420] }
  0x4b   : > { %1415 = vmatpush.msk.msra.mxu2 %vm371_vm0, %v365_v4  ;;  %1417 = vmatpush.msk.msra.mxu3 %vm371_vm0, %v366_v5  ;;  %917 = vst [vmem:[#allocation1] ss:$2 sm:$0xff] %v361_v0  ;;  %v674_v26 = vld [vmem:[#allocation6 + $0x140] sm:$0xff]  ;;  %v675_v27 = vld [vmem:[#allocation6 + $0x148] sm:$0xff]  ;;  %v672_v28 = vld [vmem:[#allocation6 + $0x130] sm:$0xff] }
  0x4c   : > { %1416 = vmatmul.msk.f32.vlgmr.msra.gmra.mxu2 %vm367_vm1, %v362_v1  ;;  %1418 = vmatmul.msk.f32.vlgmr.msra.gmra.mxu3 %vm367_vm1, %v362_v1  ;;  %v673_v29 = vld [vmem:[#allocation6 + $0x138] sm:$0xff]  ;;  %v670_v30 = vld [vmem:[#allocation6 + $0x120] sm:$0xff]  ;;  %v671_v31 = vld [vmem:[#allocation6 + $0x128] sm:$0xff] }
  0x4d   : > { %440 = vmatpush.xpose.msrb.mxu2 %v430_v2  ;;  %460 = vmatpush.xpose.msrb.mxu3 %v431_v3  ;;  %v668_v32 = vld [vmem:[#allocation6 + $0x110] sm:$0xff]  ;;  %v669_v33 = vld [vmem:[#allocation6 + $0x118] sm:$0xff]  ;;  %v666_v34 = vld [vmem:[#allocation6 + $0x100] sm:$0xff] }
  0x4e   : > { %v667_v35 = vld [vmem:[#allocation6 + $0x108] sm:$0xff]  ;;  %v491_v36 = vld [vmem:[#allocation8 + $0x70] sm:$0xff]  ;;  %v492_v37 = vld [vmem:[#allocation8 + $0x78] sm:$0xff] }
  0x4f   : > { %v489_v38 = vld [vmem:[#allocation8 + $0x60] sm:$0xff]  ;;  %505 = vmatpush.msra.mxu0 %v491_v36  ;;  %525 = vmatpush.msra.mxu1 %v492_v37  ;;  %v490_v39 = vld [vmem:[#allocation8 + $0x68] sm:$0xff]  ;;  %v487_v40 = vld [vmem:[#allocation8 + $0x50] sm:$0xff] }
  0x50   : > { %v488_v41 = vld [vmem:[#allocation8 + $0x58] sm:$0xff]  ;;  %v485_v42 = vld [vmem:[#allocation8 + $0x40] sm:$0xff]  ;;  %v486_v43 = vld [vmem:[#allocation8 + $0x48] sm:$0xff] }
  0x51   : > { %441 = vmatpush.xpose.msrb.mxu2 %v428_v6  ;;  %461 = vmatpush.xpose.msrb.mxu3 %v429_v7  ;;  %v483_v44 = vld [vmem:[#allocation8 + $0x30] sm:$0xff]  ;;  %v484_v45 = vld [vmem:[#allocation8 + $0x38] sm:$0xff]  ;;  %v481_v46 = vld [vmem:[#allocation8 + $0x20] sm:$0xff] }
  0x52   : > { %506 = vmatpush.msra.mxu0 %v489_v38  ;;  %526 = vmatpush.msra.mxu1 %v490_v39  ;;  %v482_v47 = vld [vmem:[#allocation8 + $0x28] sm:$0xff]  ;;  %v479_v48 = vld [vmem:[#allocation8 + $0x10] sm:$0xff]  ;;  %v480_v49 = vld [vmem:[#allocation8 + $0x18] sm:$0xff] }
  0x53   : > { %v477_v50 = vld [vmem:[#allocation8] sm:$0xff]  ;;  %v478_v51 = vld [vmem:[#allocation8 + $0x8] sm:$0xff]  ;;  %v552_v52 = vld [vmem:[#allocation6 + $0xf0] sm:$0xff] }
  0x54   : > { %507 = vmatpush.msra.mxu0 %v487_v40  ;;  %527 = vmatpush.msra.mxu1 %v488_v41  ;;  %v553_v53 = vld [vmem:[#allocation6 + $0xf8] sm:$0xff]  ;;  %v550_v54 = vld [vmem:[#allocation6 + $0xe0] sm:$0xff]  ;;  %v551_v55 = vld [vmem:[#allocation6 + $0xe8] sm:$0xff] }
  0x55   : > { %442 = vmatpush.xpose.msrb.mxu2 %v426_v8  ;;  %462 = vmatpush.xpose.msrb.mxu3 %v427_v9  ;;  %v548_v56 = vld [vmem:[#allocation6 + $0xd0] sm:$0xff]  ;;  %v549_v57 = vld [vmem:[#allocation6 + $0xd8] sm:$0xff]  ;;  %v546_v60 = vld [vmem:[#allocation6 + $0xc0] sm:$0xff] }
  0x56   : > { %508 = vmatpush.msra.mxu0 %v485_v42  ;;  %528 = vmatpush.msra.mxu1 %v486_v43  ;;  %v547_v61 = vld [vmem:[#allocation6 + $0xc8] sm:$0xff]  ;;  %v544_v0 = vld [vmem:[#allocation6 + $0xb0] sm:$0xff]  ;;  %v545_v1 = vld [vmem:[#allocation6 + $0xb8] sm:$0xff] }
  0x57   : > { %v542_v2 = vld [vmem:[#allocation6 + $0xa0] sm:$0xff]  ;;  %v543_v3 = vld [vmem:[#allocation6 + $0xa8] sm:$0xff]  ;;  %v540_v4 = vld [vmem:[#allocation6 + $0x90] sm:$0xff] }
  0x58   : > { %509 = vmatpush.msra.mxu0 %v483_v44  ;;  %529 = vmatpush.msra.mxu1 %v484_v45  ;;  %v541_v5 = vld [vmem:[#allocation6 + $0x98] sm:$0xff]  ;;  %v538_v6 = vld [vmem:[#allocation6 + $0x80] sm:$0xff]  ;;  %v539_v7 = vld [vmem:[#allocation6 + $0x88] sm:$0xff] }
  0x59   : > { %443 = vmatpush.xpose.msrb.mxu2 %v424_v10  ;;  %463 = vmatpush.xpose.msrb.mxu3 %v425_v11  ;;  %v474_v10 = vstv %s472_s15  ;;  %v742_v36 = vld [vmem:[#allocation8 + $0x150] sm:$0xff]  ;;  %v743_v37 = vld [vmem:[#allocation8 + $0x158] sm:$0xff]  ;;  %v740_v38 = vld [vmem:[#allocation8 + $0x140] sm:$0xff]  ;;  %s1434_s15 = sld [smem:[#allocation11 + $0x4]] }
  0x5a   : > { %510 = vmatpush.msra.mxu0 %v481_v46  ;;  %530 = vmatpush.msra.mxu1 %v482_v47  ;;  %v741_v39 = vld [vmem:[#allocation8 + $0x148] sm:$0xff]  ;;  %v738_v40 = vld [vmem:[#allocation8 + $0x130] sm:$0xff]  ;;  %v739_v41 = vld [vmem:[#allocation8 + $0x138] sm:$0xff] }
  0x5b   : > { %v736_v42 = vld [vmem:[#allocation8 + $0x120] sm:$0xff]  ;;  %v737_v43 = vld [vmem:[#allocation8 + $0x128] sm:$0xff]  ;;  %v734_v44 = vld [vmem:[#allocation8 + $0x110] sm:$0xff] }
  0x5c   : > { %511 = vmatpush.msra.mxu0 %v479_v48  ;;  %531 = vmatpush.msra.mxu1 %v480_v49  ;;  %v735_v45 = vld [vmem:[#allocation8 + $0x118] sm:$0xff]  ;;  %v732_v46 = vld [vmem:[#allocation8 + $0x100] sm:$0xff]  ;;  %v733_v47 = vld [vmem:[#allocation8 + $0x108] sm:$0xff] }
  0x5d   : > { %444 = vmatpush.xpose.msrb.mxu2 %v422_v12  ;;  %464 = vmatpush.xpose.msrb.mxu3 %v423_v13  ;;  %v620_v13 = vld [vmem:[#allocation8 + $0xf0] sm:$0xff] }
  0x5e   : > { %512 = vmatpush.msra.mxu0 %v477_v50  ;;  %532 = vmatpush.msra.mxu1 %v478_v51 }
  0x60   : > { %568 = vmatpush.xpose.msrb.mxu0 %v552_v52  ;;  %588 = vmatpush.xpose.msrb.mxu1 %v553_v53  ;;  %v602_v52 = vstv %s1421_s13  ;;  %s1441_s13 = sshll.u32 %s1836_s8, 3  ;;  %s1271_s8 = scalar_lea.sflag [#allocation4], %s1930_s21 }
  0x61   : > { %445 = vmatpush.xpose.msrb.mxu2 %v420_v14  ;;  %465 = vmatpush.xpose.msrb.mxu3 %v421_v15  ;;  %v621_v14 = vld [vmem:[#allocation8 + $0xf8] sm:$0xff] }
  0x64   : > { %569 = vmatpush.xpose.msrb.mxu0 %v550_v54  ;;  %589 = vmatpush.xpose.msrb.mxu1 %v551_v55 }
  0x65   : > { %446 = vmatpush.xpose.msrb.mxu2 %v418_v16  ;;  %466 = vmatpush.xpose.msrb.mxu3 %v419_v17  ;;  %v618_v16 = vld [vmem:[#allocation8 + $0xe0] sm:$0xff]  ;;  %v619_v17 = vld [vmem:[#allocation8 + $0xe8] sm:$0xff] }
  0x68   : > { %570 = vmatpush.xpose.msrb.mxu0 %v548_v56  ;;  %590 = vmatpush.xpose.msrb.mxu1 %v549_v57  ;;  %v806_v57 = vld [vmem:[#allocation6 + $0x1f0] sm:$0xff] }
  0x69   : > { %447 = vmatpush.xpose.msrb.mxu2 %v416_v18  ;;  %467 = vmatpush.xpose.msrb.mxu3 %v417_v19  ;;  %v616_v18 = vld [vmem:[#allocation8 + $0xd0] sm:$0xff]  ;;  %v617_v19 = vld [vmem:[#allocation8 + $0xd8] sm:$0xff] }
  0x6c   : > { %571 = vmatpush.xpose.msrb.mxu0 %v546_v60  ;;  %591 = vmatpush.xpose.msrb.mxu1 %v547_v61  ;;  %v807_v60 = vld [vmem:[#allocation6 + $0x1f8] sm:$0xff] }
  0x6d   : > { %694 = vmatpush.xpose.msra.mxu2 %v680_v20  ;;  %714 = vmatpush.xpose.msra.mxu3 %v681_v21  ;;  %v614_v20 = vld [vmem:[#allocation8 + $0xc0] sm:$0xff]  ;;  %v615_v21 = vld [vmem:[#allocation8 + $0xc8] sm:$0xff] }
  0x70   : > { %572 = vmatpush.xpose.msrb.mxu0 %v544_v0  ;;  %592 = vmatpush.xpose.msrb.mxu1 %v545_v1  ;;  %v804_v0 = vld [vmem:[#allocation6 + $0x1e0] sm:$0xff]  ;;  %v805_v1 = vld [vmem:[#allocation6 + $0x1e8] sm:$0xff] }
  0x71   : > { %695 = vmatpush.xpose.msra.mxu2 %v678_v22  ;;  %715 = vmatpush.xpose.msra.mxu3 %v679_v23 }
  0x74   : > { %573 = vmatpush.xpose.msrb.mxu0 %v542_v2  ;;  %593 = vmatpush.xpose.msrb.mxu1 %v543_v3  ;;  %v802_v3 = vld [vmem:[#allocation6 + $0x1d0] sm:$0xff] }
  0x75   : > { %696 = vmatpush.xpose.msra.mxu2 %v676_v24  ;;  %716 = vmatpush.xpose.msra.mxu3 %v677_v25  ;;  %v612_v24 = vld [vmem:[#allocation8 + $0xb0] sm:$0xff]  ;;  %v613_v25 = vld [vmem:[#allocation8 + $0xb8] sm:$0xff] }
  0x78   : > { %574 = vmatpush.xpose.msrb.mxu0 %v540_v4  ;;  %594 = vmatpush.xpose.msrb.mxu1 %v541_v5  ;;  %v803_v4 = vld [vmem:[#allocation6 + $0x1d8] sm:$0xff] }
  0x79   : > { %697 = vmatpush.xpose.msra.mxu2 %v674_v26  ;;  %717 = vmatpush.xpose.msra.mxu3 %v675_v27  ;;  %v610_v26 = vld [vmem:[#allocation8 + $0xa0] sm:$0xff]  ;;  %v611_v27 = vld [vmem:[#allocation8 + $0xa8] sm:$0xff] }
  0x7c   : > { %575 = vmatpush.xpose.msrb.mxu0 %v538_v6  ;;  %595 = vmatpush.xpose.msrb.mxu1 %v539_v7  ;;  %v800_v6 = vld [vmem:[#allocation6 + $0x1c0] sm:$0xff]  ;;  %v801_v7 = vld [vmem:[#allocation6 + $0x1c8] sm:$0xff] }
  0x7d   : > { %698 = vmatpush.xpose.msra.mxu2 %v672_v28  ;;  %718 = vmatpush.xpose.msra.mxu3 %v673_v29  ;;  %v608_v28 = vld [vmem:[#allocation8 + $0x90] sm:$0xff]  ;;  %v609_v29 = vld [vmem:[#allocation8 + $0x98] sm:$0xff] }
  0x81   : > { %699 = vmatpush.xpose.msra.mxu2 %v670_v30  ;;  %719 = vmatpush.xpose.msra.mxu3 %v671_v31  ;;  %v606_v30 = vld [vmem:[#allocation8 + $0x80] sm:$0xff]  ;;  %v607_v31 = vld [vmem:[#allocation8 + $0x88] sm:$0xff] }
  0x85   : > { %700 = vmatpush.xpose.msra.mxu2 %v668_v32  ;;  %720 = vmatpush.xpose.msra.mxu3 %v669_v33  ;;  %v746_v32 = vld [vmem:[#allocation8 + $0x170] sm:$0xff]  ;;  %v747_v33 = vld [vmem:[#allocation8 + $0x178] sm:$0xff] }
  0x89   : > { %701 = vmatpush.xpose.msra.mxu2 %v666_v34  ;;  %721 = vmatpush.xpose.msra.mxu3 %v667_v35  ;;  %v744_v34 = vld [vmem:[#allocation8 + $0x160] sm:$0xff]  ;;  %v745_v35 = vld [vmem:[#allocation8 + $0x168] sm:$0xff] }
  0xcf   : > { %v1957_v58 = vpop.f32.mrf.mxu2  ;;  %v1959_v59 = vpop.f32.mrf.mxu3 }
  0xd0   : > { %448 = vmatmul.f32.vlgmr.msrb.gmra.mxu2 %v1957_v58  ;;  %468 = vmatmul.f32.vlgmr.msrb.gmra.mxu3 %v1959_v59  ;;  %v682_v62 = vrot.slane %v1957_v58, 4  ;;  %v683_v63 = vrot.slane %v1959_v59, 4  ;;  %v556_v22 = vrot.slane %v1957_v58, 2  ;;  %v557_v23 = vrot.slane %v1959_v59, 2 }
  0xd8   : > { %702 = vmatmul.f32.vlgmr.msra.gmra.mxu2 %v682_v62  ;;  %722 = vmatmul.f32.vlgmr.msra.gmra.mxu3 %v683_v63  ;;  %v728_v63 = vstv %s1424_s17 }
 0x153   : > { %v449_v8 = vpop.f32.mrf.mxu2  ;;  %v469_v9 = vpop.f32.mrf.mxu3 }
 0x154   : > { %v470_v11 = vadd.f32 %v469_v9, %v449_v8  ;;  %v798_v8 = vld [vmem:[#allocation6 + $0x1b0] sm:$0xff]  ;;  %v799_v9 = vld [vmem:[#allocation6 + $0x1b8] sm:$0xff] }
 0x156   : > { %v475_v12 = vmul.f32 %v474_v10, %v470_v11  ;;  %vm473_vm2 = vcmp.gt.f32.partialorder %v470_v11, 0.0  ;;  %v796_v10 = vld [vmem:[#allocation6 + $0x1a0] sm:$0xff] }
 0x158   : > { %v476_v15 = vsel %vm473_vm2, %v470_v11, %v475_v12  ;;  %v797_v11 = vld [vmem:[#allocation6 + $0x1a8] sm:$0xff]  ;;  %v794_v12 = vld [vmem:[#allocation6 + $0x190] sm:$0xff]  ;;  %vm1206_vm2 = vcmask 883712  }
 0x159   : > { %1419 = vmatmul.msk.f32.vlgmr.msra.gmra.mxu0 %vm493_vm3, %v476_v15  ;;  %1420 = vmatmul.msk.f32.vlgmr.msra.gmra.mxu1 %vm493_vm3, %v476_v15  ;;  %v793_v15 = vld [vmem:[#allocation6 + $0x188] sm:$0xff] }
 0x15a   : > { %633 = vmatpush.msra.mxu0 %v620_v13  ;;  %653 = vmatpush.msra.mxu1 %v621_v14  ;;  %v795_v13 = vld [vmem:[#allocation6 + $0x198] sm:$0xff]  ;;  %v792_v14 = vld [vmem:[#allocation6 + $0x180] sm:$0xff] }
 0x15b   : > { %v703_v54 = vpop.f32.mrf.mxu2  ;;  %v723_v55 = vpop.f32.mrf.mxu3 }
 0x15c   : > { %634 = vmatpush.msra.mxu0 %v618_v16  ;;  %654 = vmatpush.msra.mxu1 %v619_v17  ;;  %v724_v61 = vadd.f32 %v723_v55, %v703_v54  ;;  %v808_v16 = vrot.slane %v1957_v58, 6  ;;  %v809_v17 = vrot.slane %v1959_v59, 6  ;;  %v864_v58 = vld [vmem:[#allocation8 + $0x1b0] sm:$0xff]  ;;  %v865_v59 = vld [vmem:[#allocation8 + $0x1b8] sm:$0xff] }
 0x15e   : > { %635 = vmatpush.msra.mxu0 %v616_v18  ;;  %655 = vmatpush.msra.mxu1 %v617_v19  ;;  %v729_v2 = vmul.f32 %v728_v63, %v724_v61  ;;  %vm727_vm5 = vcmp.gt.f32.partialorder %v724_v61, 0.0  ;;  %v872_v18 = vld [vmem:[#allocation8 + $0x1f0] sm:$0xff]  ;;  %v873_v19 = vld [vmem:[#allocation8 + $0x1f8] sm:$0xff] }
 0x15f   : > { %885 = vmatpush.msrb.mxu2 %v872_v18  ;;  %905 = vmatpush.msrb.mxu3 %v873_v19 }
 0x160   : > { %636 = vmatpush.msra.mxu0 %v614_v20  ;;  %656 = vmatpush.msra.mxu1 %v615_v21  ;;  %v730_v5 = vsel %vm727_vm5, %v724_v61, %v729_v2  ;;  %v870_v20 = vld [vmem:[#allocation8 + $0x1e0] sm:$0xff]  ;;  %v871_v21 = vld [vmem:[#allocation8 + $0x1e8] sm:$0xff] }
 0x161   : > { %576 = vmatmul.f32.vlgmr.msrb.gmra.mxu0 %v556_v22  ;;  %596 = vmatmul.f32.vlgmr.msrb.gmra.mxu1 %v557_v23  ;;  %v868_v22 = vld [vmem:[#allocation8 + $0x1d0] sm:$0xff]  ;;  %v869_v23 = vld [vmem:[#allocation8 + $0x1d8] sm:$0xff] }
 0x162   : > { %637 = vmatpush.msra.mxu0 %v612_v24  ;;  %657 = vmatpush.msra.mxu1 %v613_v25  ;;  %v866_v24 = vld [vmem:[#allocation8 + $0x1c0] sm:$0xff]  ;;  %v867_v25 = vld [vmem:[#allocation8 + $0x1c8] sm:$0xff] }
 0x163   : > { %886 = vmatpush.msrb.mxu2 %v870_v20  ;;  %906 = vmatpush.msrb.mxu3 %v871_v21 }
 0x164   : > { %638 = vmatpush.msra.mxu0 %v610_v26  ;;  %658 = vmatpush.msra.mxu1 %v611_v27 }
 0x165   : > { %887 = vmatpush.msrb.mxu2 %v868_v22  ;;  %907 = vmatpush.msrb.mxu3 %v869_v23 }
 0x166   : > { %639 = vmatpush.msra.mxu0 %v608_v28  ;;  %659 = vmatpush.msra.mxu1 %v609_v29  ;;  %v918_v28 = vld.sshfl [vmem:[#allocation1] sm:$0xff pattern:$0x75316420]  ;;  %v919_v29 = vld.sshfl [vmem:[#allocation1 + $0x8] sm:$0xff pattern:$0x75316420] }
 0x167   : > { %888 = vmatpush.msrb.mxu2 %v866_v24  ;;  %908 = vmatpush.msrb.mxu3 %v867_v25  ;;  %v1131_v24 = vld [vmem:[#allocation9 + $0x10] sm:$0x3] }
 0x168   : > { %640 = vmatpush.msra.mxu0 %v606_v30  ;;  %660 = vmatpush.msra.mxu1 %v607_v31 }
 0x169   : > { %889 = vmatpush.msrb.mxu2 %v864_v58  ;;  %909 = vmatpush.msrb.mxu3 %v865_v59 }
 0x16a   : > { %759 = vmatpush.msrb.mxu0 %v746_v32  ;;  %779 = vmatpush.msrb.mxu1 %v747_v33  ;;  %v862_v32 = vld [vmem:[#allocation8 + $0x1a0] sm:$0xff]  ;;  %v863_v33 = vld [vmem:[#allocation8 + $0x1a8] sm:$0xff] }
 0x16b   : > { %890 = vmatpush.msrb.mxu2 %v862_v32  ;;  %910 = vmatpush.msrb.mxu3 %v863_v33 }
 0x16c   : > { %760 = vmatpush.msrb.mxu0 %v744_v34  ;;  %780 = vmatpush.msrb.mxu1 %v745_v35 }
 0x16e   : > { %761 = vmatpush.msrb.mxu0 %v742_v36  ;;  %781 = vmatpush.msrb.mxu1 %v743_v37 }
 0x170   : > { %762 = vmatpush.msrb.mxu0 %v740_v38  ;;  %782 = vmatpush.msrb.mxu1 %v741_v39  ;;  %v860_v38 = vld [vmem:[#allocation8 + $0x190] sm:$0xff]  ;;  %v861_v39 = vld [vmem:[#allocation8 + $0x198] sm:$0xff] }
 0x171   : > { %891 = vmatpush.msrb.mxu2 %v860_v38  ;;  %911 = vmatpush.msrb.mxu3 %v861_v39  ;;  %v1059_v38 = vld [vmem:[#allocation9 + $0xa] sm:$0x3] }
 0x172   : > { %763 = vmatpush.msrb.mxu0 %v738_v40  ;;  %783 = vmatpush.msrb.mxu1 %v739_v41 }
 0x174   : > { %764 = vmatpush.msrb.mxu0 %v736_v42  ;;  %784 = vmatpush.msrb.mxu1 %v737_v43  ;;  %v858_v42 = vld [vmem:[#allocation8 + $0x180] sm:$0xff]  ;;  %v859_v43 = vld [vmem:[#allocation8 + $0x188] sm:$0xff] }
 0x175   : > { %892 = vmatpush.msrb.mxu2 %v858_v42  ;;  %912 = vmatpush.msrb.mxu3 %v859_v43 }
 0x176   : > { %765 = vmatpush.msrb.mxu0 %v734_v44  ;;  %785 = vmatpush.msrb.mxu1 %v735_v45 }
 0x178   : > { %766 = vmatpush.msrb.mxu0 %v732_v46  ;;  %786 = vmatpush.msrb.mxu1 %v733_v47 }
 0x1d6   : > { %v1969_v48 = vpop.f32.mrf.mxu0  ;;  %v1971_v49 = vpop.f32.mrf.mxu1 }
 0x1d7   : > { %v924_v26 = vrot.slane %v1969_v48, 4  ;;  %v925_v27 = vrot.slane %v1971_v49, 4  ;;  %v854_v48 = vstv %s1427_s12 }
 0x1d9   : > { %v940_v36 = vsel %vm371_vm0, %v918_v28, %v924_v26  ;;  %v941_v37 = vsel %vm371_vm0, %v919_v29, %v925_v27  ;;  %v1133_v28 = vperm.slane %v1131_v24, 0  ;;  %v1134_v29 = vperm.slane %v1131_v24, 1 }
 0x1de   : > { %v577_v50 = vpop.f32.mrf.mxu0  ;;  %v597_v51 = vpop.f32.mrf.mxu1 }
 0x1df   : > { %v598_v53 = vadd.f32 %v597_v51, %v577_v50 }
 0x1e1   : > { %vm601_vm4 = vcmp.gt.f32.partialorder %v598_v53, 0.0  ;;  %v603_v56 = vmul.f32 %v602_v52, %v598_v53 }
 0x1e3   : > { %v604_v62 = vsel %vm601_vm4, %v598_v53, %v603_v56 }
 0x1e4   : > { %1422 = vmatmul.msk.f32.vlgmr.msra.gmra.mxu0 %vm493_vm3, %v604_v62  ;;  %1423 = vmatmul.msk.f32.vlgmr.msra.gmra.mxu1 %vm493_vm3, %v604_v62 }
 0x1e5   : > { %820 = vmatpush.xpose.msra.mxu0 %v806_v57  ;;  %840 = vmatpush.xpose.msra.mxu1 %v807_v60 }
 0x1e9   : > { %821 = vmatpush.xpose.msra.mxu0 %v804_v0  ;;  %841 = vmatpush.xpose.msra.mxu1 %v805_v1 }
 0x1ec   : > { %1425 = vmatmul.msk.f32.vlgmr.msrb.gmra.mxu0 %vm493_vm3, %v730_v5  ;;  %1426 = vmatmul.msk.f32.vlgmr.msrb.gmra.mxu1 %vm493_vm3, %v730_v5 }
 0x1ed   : > { %822 = vmatpush.xpose.msra.mxu0 %v802_v3  ;;  %842 = vmatpush.xpose.msra.mxu1 %v803_v4 }
 0x1f1   : > { %823 = vmatpush.xpose.msra.mxu0 %v800_v6  ;;  %843 = vmatpush.xpose.msra.mxu1 %v801_v7 }
 0x1f5   : > { %824 = vmatpush.xpose.msra.mxu0 %v798_v8  ;;  %844 = vmatpush.xpose.msra.mxu1 %v799_v9 }
 0x1f9   : > { %825 = vmatpush.xpose.msra.mxu0 %v796_v10  ;;  %845 = vmatpush.xpose.msra.mxu1 %v797_v11 }
 0x1fd   : > { %826 = vmatpush.xpose.msra.mxu0 %v794_v12  ;;  %846 = vmatpush.xpose.msra.mxu1 %v795_v13  ;;  %v956_v12 = vlaneseq }
 0x1ff   : > { %v2069_v13 = vand.u32 127, %v956_v12 }
 0x201   : > { %827 = vmatpush.xpose.msra.mxu0 %v792_v14  ;;  %847 = vmatpush.xpose.msra.mxu1 %v793_v15  ;;  %vm1101_vm9 = vcmp.lt.s32.totalorder %v2069_v13, 112  ;;  %vm1125_vm10 = vcmp.lt.s32.totalorder %v2069_v13, 111  ;;  %vm1053_vm11 = vcmp.lt.s32.totalorder %v2069_v13, 127  ;;  %vm1077_vm12 = vcmp.lt.s32.totalorder %v2069_v13, 113 }
 0x202   : > { %vm1029_vm13 = vcmp.lt.s32.totalorder %v2069_v13, 1  ;;  %vm1005_vm14 = vcmp.lt.s32.totalorder %v2069_v13, 15  ;;  %vm981_vm15 = vcmp.lt.s32.totalorder %v2069_v13, 16  ;;  %vm958_vm1 = vcmp.lt.s32.totalorder %v2069_v13, 17 }
 0x204   : > { %828 = vmatmul.f32.vlgmr.msra.gmra.mxu0 %v808_v16  ;;  %848 = vmatmul.f32.vlgmr.msra.gmra.mxu1 %v809_v17  ;;  %v1107_v16 = vld [vmem:[#allocation9 + $0xe] sm:$0x3] }
 0x205   : > { %v1109_v18 = vperm.slane %v1107_v16, 0  ;;  %v1110_v19 = vperm.slane %v1107_v16, 1 }
 0x261   : > { %v642_v30 = vpop.f32.mrf.mxu0  ;;  %v662_v31 = vpop.f32.mrf.mxu1 }
 0x262   : > { %v930_v34 = vrot.slane %v642_v30, 2  ;;  %v931_v35 = vrot.slane %v662_v31, 2 }
 0x264   : > { %v1983_v40 = vsel %vm942_vm6, %v940_v36, %v930_v34  ;;  %v1985_v41 = vsel %vm942_vm6, %v941_v37, %v931_v35  ;;  %v1083_v37 = vld [vmem:[#allocation9 + $0xc] sm:$0x3] }
 0x265   : > { %1097 = vrot.lane.b32.xlu2 %v1985_v41, %s1764_s14  ;;  %1117 = vrot.lane.b32.xlu0 %v1983_v40, %s1765_s19 }
 0x266   : > { %1093 = vrot.lane.b32.xlu1 %v1983_v40, %s1764_s14 }
 0x269   : > { %v768_v44 = vpop.f32.mrf.mxu0  ;;  %v788_v45 = vpop.f32.mrf.mxu1 }
 0x26d   : > { %1069 = vrot.lane.b32.xlu2 %v1983_v40, %s1766_s28  ;;  %1049 = vrot.lane.b32.xlu0 %v1985_v41, %s1767_s29 }
 0x26e   : > { %1121 = vrot.lane.b32.xlu1 %v1985_v41, %s1765_s19 }
 0x275   : > { %997 = vrot.lane.b32.xlu2 %v1983_v40, %s1768_s10  ;;  %1073 = vrot.lane.b32.xlu0 %v1985_v41, %s1766_s28 }
 0x276   : > { %1045 = vrot.lane.b32.xlu1 %v1983_v40, %s1767_s29 }
 0x27d   : > { %1025 = vrot.lane.b32.xlu0 %v1985_v41, %s1769_s18 }
 0x27e   : > { %1021 = vrot.lane.b32.xlu1 %v1983_v40, %s1769_s18 }
 0x281   : > { %v829_v46 = vpop.f32.mrf.mxu0  ;;  %v849_v47 = vpop.f32.mrf.mxu1 }
 0x282   : > { %v850_v49 = vadd.f32 %v849_v47, %v829_v46 }
 0x284   : > { %vm853_vm7 = vcmp.gt.f32.partialorder %v850_v49, 0.0  ;;  %v855_v50 = vmul.f32 %v854_v48, %v850_v49 }
 0x285   : > { %977 = vrot.lane.b32.xlu0 %v1985_v41, %s1770_s11 }
 0x286   : > { %v856_v51 = vsel %vm853_vm7, %v850_v49, %v855_v50  ;;  %973 = vrot.lane.b32.xlu1 %v1983_v40, %s1770_s11  ;;  %v1085_v49 = vperm.slane %v1083_v37, 0  ;;  %v1086_v50 = vperm.slane %v1083_v37, 1 }
 0x287   : > { %1428 = vmatmul.msk.f32.vlgmr.msrb.gmra.mxu2 %vm493_vm3, %v856_v51  ;;  %1429 = vmatmul.msk.f32.vlgmr.msrb.gmra.mxu3 %vm493_vm3, %v856_v51  ;;  %v1061_v51 = vperm.slane %v1059_v38, 0 }
 0x2bf   : > { %v1098_v60 = vpop.permute.xlu2 %1097 }
 0x2c7   : > { %v2049_v63 = vpop.permute.xlu2 %1069 }
 0x2cf   : > { %v2053_v2 = vpop.permute.xlu2 %997 }
 0x2d7   : > { %v1118_v62 = vpop.permute.xlu0 %1117 }
 0x2d8   : > { %v1094_v61 = vpop.permute.xlu1 %1093 }
 0x2d9   : > { %v1102_v22 = vsel %vm1101_vm9, %v1094_v61, %v1098_v60  ;;  %v1104_v23 = vsel %vm1101_vm9, %v1098_v60, %v1094_v61 }
 0x2da   : > { %v1113_v26 = vmul.f32 %v1109_v18, %v1102_v22  ;;  %v1114_v27 = vmul.f32 %v1110_v19, %v1104_v23 }
 0x2dc   : > { %v1187_v46 = vrot.slane %v1113_v26, 4  ;;  %v1188_v47 = vrot.slane %v1114_v27, 4 }
 0x2df   : > { %v2051_v1 = vpop.permute.xlu0 %1049 }
 0x2e0   : > { %v1122_v0 = vpop.permute.xlu1 %1121 }
 0x2e1   : > { %v1126_v31 = vsel %vm1125_vm10, %v1118_v62, %v1122_v0  ;;  %v1128_v32 = vsel %vm1125_vm10, %v1122_v0, %v1118_v62 }
 0x2e7   : > { %v2057_v4 = vpop.permute.xlu0 %1073 }
 0x2e8   : > { %v2055_v3 = vpop.permute.xlu1 %1045  ;;  %v1078_v0 = vsel %vm1077_vm12, %v2049_v63, %v2057_v4 }
 0x2ef   : > { %v2061_v7 = vpop.permute.xlu0 %1025 }
 0x2f0   : > { %v2059_v6 = vpop.permute.xlu1 %1021 }
 0x2f1   : > { %v1030_v26 = vsel %vm1029_vm13, %v2059_v6, %v2061_v7  ;;  %v1032_v27 = vsel %vm1029_vm13, %v2061_v7, %v2059_v6 }
 0x2f7   : > { %v2067_v11 = vpop.permute.xlu0 %977 }
 0x2f8   : > { %v2065_v9 = vpop.permute.xlu1 %973 }
 0x30a   : > { %v894_v52 = vpop.f32.mrf.mxu2  ;;  %v914_v53 = vpop.f32.mrf.mxu3 }
 0x30b   : > { %v936_v54 = vrot.slane %v894_v52, 6  ;;  %v937_v55 = vrot.slane %v914_v53, 6  ;;  %v1035_v52 = vld [vmem:[#allocation9 + $0x6] sm:$0x3] }
 0x30c   : > { %v1038_v23 = vperm.slane %v1035_v52, 1 }
 0x30d   : > { %v2013_v56 = vsel %vm945_vm8, %v768_v44, %v936_v54  ;;  %v2015_v57 = vsel %vm945_vm8, %v788_v45, %v937_v55  ;;  %v1137_v44 = vmul.f32 %v1133_v28, %v1126_v31  ;;  %v1138_v45 = vmul.f32 %v1134_v29, %v1128_v32 }
 0x30e   : > { %1099 = vrot.lane.b32.xlu2 %v2015_v57, %s1764_s14  ;;  %1095 = vrot.lane.b32.xlu1 %v2013_v56, %s1764_s14  ;;  %v1062_v54 = vperm.slane %v1059_v38, 1  ;;  %v1054_v55 = vsel %vm1053_vm11, %v2055_v3, %v2051_v1  ;;  %v1042_v6 = vmul.f32 %v1038_v23, %v1030_v26 }
 0x30f   : > { %1119 = vrot.lane.b32.xlu0 %v2013_v56, %s1765_s19 }
 0x316   : > { %1071 = vrot.lane.b32.xlu2 %v2013_v56, %s1766_s28  ;;  %1051 = vrot.lane.b32.xlu1 %v2015_v57, %s1767_s29 }
 0x317   : > { %1123 = vrot.lane.b32.xlu0 %v2015_v57, %s1765_s19  ;;  %s1282_s19 = scalar_lea.hbm %s2227_s7, %s1441_s13 }
 0x31e   : > { %1047 = vrot.lane.b32.xlu2 %v2013_v56, %s1767_s29  ;;  %1027 = vrot.lane.b32.xlu1 %v2015_v57, %s1769_s18 }
 0x31f   : > { %1075 = vrot.lane.b32.xlu0 %v2015_v57, %s1766_s28  ;;  %s360_s28 = scalar_lea.vmem [#allocation12], %s1409_s30 }
 0x320   : > { %s1284_s29 = sshll.u32 %s360_s28, 4  ;;  %s1285_s29 = int_to_ptr.vmem [resolvable:$true] %s1284_s29 }
 0x326   : > { %1023 = vrot.lane.b32.xlu2 %v2013_v56, %s1769_s18  ;;  %979 = vrot.lane.b32.xlu1 %v2015_v57, %s1770_s11 }
 0x327   : > { %1003 = vrot.lane.b32.xlu0 %v2015_v57, %s1768_s10 }
 0x32e   : > { %999 = vrot.lane.b32.xlu2 %v2013_v56, %s1768_s10  ;;  %950 = vrot.lane.b32.xlu1 %v2013_v56, %s1771_s1 }
 0x32f   : > { %1001 = vrot.lane.b32.xlu0 %v1985_v41, %s1768_s10  ;;  %s1286_s10 = sshll.u32 %s1282_s19, 4  ;;  %s1287_s10 = int_to_ptr.hbm [resolvable:$true] %s1286_s10 }
 0x330   : > { %s1690_s12 = sshra.s32 %s1287_s10, 4  ;;  %s1691_s12 = int_to_ptr.hbm [resolvable:$true] %s1690_s12 }
 0x331   : > { %s1692_s18 = scalar_lea.hbm %s1691_s12, 8  ;;  %p1697_p12 = scmp.lt.s32.totalorder %s1691_s12, %s2227_s7 }
 0x332   : > { %p1693_p1 = scmp.ne.s32.totalorder %s1691_s12, %s1692_s18 }
 0x334   : > { %p1694_p3 = pnand %p1693_p1, %p1899_p4 }
 0x336   : > { %975 = vrot.lane.b32.xlu2 %v2013_v56, %s1770_s11  ;;  %952 = vrot.lane.b32.xlu1 %v1985_v41, %s1771_s1  ;;  %p1695_p5 = pneg %p1694_p3 }
 0x337   : > { %948 = vrot.lane.b32.xlu0 %v1983_v40, %s1771_s1 }
 0x33e   : > { %954 = vrot.lane.b32.xlu2 %v2015_v57, %s1771_s1  ;;  %s1696_s1 = scalar_lea.hbm %s2227_s7, 16 }
 0x33f   : > { %p1698_p7 = scmp.lt.s32.totalorder %s1696_s1, %s1692_s18 }
 0x341   : > { %p1699_p8 = por %p1698_p7, %p1697_p12 }
 0x343   : > { %p1700_p9 = pnand %p1699_p8, %p1695_p5 }
 0x368   : > { %v1100_v5 = vpop.permute.xlu2 %1099 }
 0x370   : > { %v2063_v8 = vpop.permute.xlu2 %1071 }
 0x378   : > { %v1048_v10 = vpop.permute.xlu2 %1047 }
 0x380   : > { %v1096_v14 = vpop.permute.xlu1 %1095  ;;  %v2071_v17 = vpop.permute.xlu2 %1023 }
 0x381   : > { %v1120_v15 = vpop.permute.xlu0 %1119  ;;  %v1103_v20 = vsel %vm1101_vm9, %v1096_v14, %v1100_v5  ;;  %v1105_v21 = vsel %vm1101_vm9, %v1100_v5, %v1096_v14  ;;  %v1056_v5 = vsel %vm1053_vm11, %v2051_v1, %v2055_v3  ;;  %v1037_v14 = vperm.slane %v1035_v52, 0 }
 0x382   : > { %v1115_v25 = vmul.f32 %v1109_v18, %v1103_v20  ;;  %v1116_v58 = vmul.f32 %v1110_v19, %v1105_v21  ;;  %v1080_v1 = vsel %vm1077_vm12, %v2057_v4, %v2049_v63  ;;  %v1065_v3 = vmul.f32 %v1061_v51, %v1054_v55 }
 0x383   : > { %v1089_v21 = vmul.f32 %v1085_v49, %v1078_v0  ;;  %v1066_v22 = vmul.f32 %v1062_v54, %v1056_v5  ;;  %v1090_v4 = vmul.f32 %v1086_v50, %v1080_v1 }
 0x384   : > { %v1189_v39 = vrot.slane %v1115_v25, 4  ;;  %v1191_v42 = vrot.slane %v1116_v58, 4  ;;  %v987_v25 = vld [vmem:[#allocation9 + $0x2] sm:$0x3] }
 0x385   : > { %v1174_v32 = vrot.slane %v1066_v22, 4 }
 0x386   : > { %v1190_v61 = vsel %vm371_vm0, %v1187_v46, %v1189_v39  ;;  %v1192_v62 = vsel %vm371_vm0, %v1188_v47, %v1191_v42 }
 0x388   : > { %v1052_v59 = vpop.permute.xlu1 %1051  ;;  %v2075_v43 = vpop.permute.xlu2 %999 }
 0x389   : > { %v1124_v30 = vpop.permute.xlu0 %1123  ;;  %v1055_v48 = vsel %vm1053_vm11, %v1048_v10, %v1052_v59  ;;  %v1057_v53 = vsel %vm1053_vm11, %v1052_v59, %v1048_v10 }
 0x38a   : > { %v1127_v33 = vsel %vm1125_vm10, %v1120_v15, %v1124_v30  ;;  %v1129_v34 = vsel %vm1125_vm10, %v1124_v30, %v1120_v15  ;;  %v1067_v10 = vmul.f32 %v1061_v51, %v1055_v48  ;;  %v1068_v15 = vmul.f32 %v1062_v54, %v1057_v53 }
 0x38b   : > { %v1139_v35 = vmul.f32 %v1133_v28, %v1127_v33  ;;  %v1140_v36 = vmul.f32 %v1134_v29, %v1129_v34  ;;  %v1173_v30 = vrot.slane %v1065_v3, 4  ;;  %v989_v33 = vperm.slane %v987_v25, 0 }
 0x38c   : > { %v1175_v58 = vrot.slane %v1067_v10, 4  ;;  %v1177_v28 = vrot.slane %v1068_v15, 4  ;;  %v984_v51 = vsel %vm981_vm15, %v2067_v11, %v2065_v9  ;;  %v1202_v53 = vsel %vm371_vm0, %v2015_v57, %v1174_v32 }
 0x38d   : > { %1430 = vmatpush.msk.msra.mxu2 %vm371_vm0, %v1139_v35  ;;  %1432 = vmatpush.msk.msra.mxu3 %vm371_vm0, %v1140_v36  ;;  %v1041_v36 = vmul.f32 %v1037_v14, %v1032_v27  ;;  %v993_v5 = vmul.f32 %v989_v33, %v984_v51 }
 0x38e   : > { %v1176_v38 = vsel %vm371_vm0, %v1173_v30, %v1175_v58 }
 0x38f   : > { %1219 = vmatpush.msra.mxu2 %v1137_v44  ;;  %1239 = vmatpush.msra.mxu3 %v1138_v45  ;;  %v1178_v45 = vsel %vm371_vm0, %v1174_v32, %v1177_v28  ;;  %v1159_v54 = vrot.slane %v1041_v36, 4  ;;  %v1259_v32 = vstv %s1434_s15 }
 0x390   : > { %v1028_v60 = vpop.permute.xlu1 %1027  ;;  %v976_v29 = vpop.permute.xlu2 %975 }
 0x391   : > { %1220 = vmatpush.msra.mxu2 %v1190_v61  ;;  %1240 = vmatpush.msra.mxu3 %v1192_v62  ;;  %v1076_v12 = vpop.permute.xlu0 %1075  ;;  %v1033_v24 = vsel %vm1029_vm13, %v1028_v60, %v2071_v17  ;;  %v1160_v61 = vrot.slane %v1042_v6, 4 }
 0x392   : > { %v1079_v16 = vsel %vm1077_vm12, %v2063_v8, %v1076_v12  ;;  %v1081_v18 = vsel %vm1077_vm12, %v1076_v12, %v2063_v8  ;;  %v1031_v8 = vsel %vm1029_vm13, %v2071_v17, %v1028_v60  ;;  %v2126_v17 = vld [vmem:[#allocation9 + $0x4] sm:$0x3]  ;;  %v1043_v31 = vmul.f32 %v1037_v14, %v1033_v24 }
 0x393   : > { %v1091_v19 = vmul.f32 %v1085_v49, %v1079_v16  ;;  %v1092_v20 = vmul.f32 %v1086_v50, %v1081_v18  ;;  %v1044_v34 = vmul.f32 %v1038_v23, %v1031_v8  ;;  %v1013_v7 = vperm.slane %v2126_v17, 0 }
 0x394   : > { %v1014_v42 = vperm.slane %v2126_v17, 1  ;;  %v1201_v49 = vsel %vm371_vm0, %v2013_v56, %v1173_v30  ;;  %v990_v50 = vperm.slane %v987_v25, 1  ;;  %v963_v56 = vld [vmem:[#allocation9] sm:$0x3]  ;;  %v1145_v24 = vrot.slane %v993_v5, 4 }
 0x395   : > { %v1203_v59 = vsel %vm371_vm0, %v1091_v19, %v1187_v46  ;;  %v1204_v63 = vsel %vm371_vm0, %v1092_v20, %v1188_v47  ;;  %v1161_v46 = vrot.slane %v1043_v31, 4  ;;  %v1163_v52 = vrot.slane %v1044_v34, 4  ;;  %v1205_v31 = vld [vmem:[%s2224_s4] sm:$0xf] }
 0x396   : > { %1221 = vmatpush.msra.mxu2 %v1203_v59  ;;  %1241 = vmatpush.msra.mxu3 %v1204_v63  ;;  %v966_v14 = vperm.slane %v963_v56, 1 }
 0x397   : > { %v1162_v57 = vsel %vm371_vm0, %v1159_v54, %v1161_v46 }
 0x398   : > { %1222 = vmatpush.msra.mxu2 %v1089_v21  ;;  %1242 = vmatpush.msra.mxu3 %v1090_v4  ;;  %v980_v35 = vpop.permute.xlu1 %979  ;;  %v955_v12 = vpop.permute.xlu2 %954 }
 0x399   : > { %v1004_v37 = vpop.permute.xlu0 %1003  ;;  %v985_v39 = vsel %vm981_vm15, %v980_v35, %v976_v29  ;;  %v983_v47 = vsel %vm981_vm15, %v976_v29, %v980_v35 }
 0x39a   : > { %v1009_v44 = vsel %vm1005_vm14, %v1004_v37, %v2075_v43  ;;  %1223 = vmatpush.msra.mxu2 %v1176_v38  ;;  %v1007_v48 = vsel %vm1005_vm14, %v2075_v43, %v1004_v37  ;;  %1243 = vmatpush.msra.mxu3 %v1178_v45  ;;  %v982_v43 = vsel %vm981_vm15, %v2065_v9, %v2067_v11  ;;  %v965_v11 = vperm.slane %v963_v56, 0 }
 0x39b   : > { %v995_v55 = vmul.f32 %v989_v33, %v985_v39  ;;  %v1019_v60 = vmul.f32 %v1013_v7, %v1009_v44  ;;  %v996_v62 = vmul.f32 %v990_v50, %v983_v47  ;;  %v1020_v0 = vmul.f32 %v1014_v42, %v1007_v48 }
 0x39c   : > { %1224 = vmatpush.msra.mxu2 %v1201_v49  ;;  %1244 = vmatpush.msra.mxu3 %v1202_v53  ;;  %v994_v10 = vmul.f32 %v990_v50, %v982_v43  ;;  %v1164_v9 = vsel %vm371_vm0, %v1160_v61, %v1163_v52 }
 0x39d   : > { %v1147_v16 = vrot.slane %v995_v55, 4  ;;  %v1149_v3 = vrot.slane %v996_v62, 4  ;;  %v1200_v21 = vsel %vm371_vm0, %v1020_v0, %v1160_v61 }
 0x39e   : > { %1225 = vmatpush.msra.mxu2 %v1983_v40  ;;  %1245 = vmatpush.msra.mxu3 %v1985_v41  ;;  %v1199_v41 = vsel %vm371_vm0, %v1019_v60, %v1159_v54  ;;  %v1146_v25 = vrot.slane %v994_v10, 4 }
 0x39f   : > { %v1148_v59 = vsel %vm371_vm0, %v1145_v24, %v1147_v16 }
 0x3a0   : > { %1226 = vmatpush.msra.mxu2 %v1162_v57  ;;  %v951_v15 = vpop.permute.xlu1 %950  ;;  %1246 = vmatpush.msra.mxu3 %v1164_v9  ;;  %v1150_v63 = vsel %vm371_vm0, %v1146_v25, %v1149_v3 }
 0x3a1   : > { %v960_v40 = vsel %vm958_vm1, %v951_v15, %v955_v12  ;;  %v962_v18 = vsel %vm958_vm1, %v955_v12, %v951_v15  ;;  %v1002_v1 = vpop.permute.xlu0 %1001 }
 0x3a2   : > { %v1006_v19 = vsel %vm1005_vm14, %v2053_v2, %v1002_v1  ;;  %v1008_v20 = vsel %vm1005_vm14, %v1002_v1, %v2053_v2  ;;  %1227 = vmatpush.msra.mxu2 %v1199_v41  ;;  %1247 = vmatpush.msra.mxu3 %v1200_v21  ;;  %v971_v58 = vmul.f32 %v965_v11, %v962_v18 }
 0x3a3   : > { %v1017_v22 = vmul.f32 %v1013_v7, %v1008_v20  ;;  %v1018_v23 = vmul.f32 %v1014_v42, %v1006_v19  ;;  %v972_v8 = vmul.f32 %v966_v14, %v960_v40 }
 0x3a4   : > { %v1197_v26 = vsel %vm371_vm0, %v971_v58, %v1145_v24 }
 0x3a5   : > { %1228 = vmatpush.msra.mxu2 %v1017_v22  ;;  %1248 = vmatpush.msra.mxu3 %v1018_v23  ;;  %v1198_v2 = vsel %vm371_vm0, %v972_v8, %v1146_v25 }
 0x3a7   : > { %1229 = vmatpush.msra.mxu2 %v1148_v59  ;;  %1249 = vmatpush.msra.mxu3 %v1150_v63 }
 0x3a8   : > { %v953_v4 = vpop.permute.xlu1 %952 }
 0x3a9   : > { %1250 = vmatpush.msra.mxu3 %v1198_v2  ;;  %v949_v27 = vpop.permute.xlu0 %948  ;;  %1230 = vmatpush.msra.mxu2 %v1197_v26 }
 0x3aa   : > { %v959_v28 = vsel %vm958_vm1, %v949_v27, %v953_v4  ;;  %v961_v29 = vsel %vm958_vm1, %v953_v4, %v949_v27 }
 0x3ab   : > { %v969_v17 = vmul.f32 %v965_v11, %v961_v29  ;;  %v970_v30 = vmul.f32 %v966_v14, %v959_v28 }
 0x3ad   : > { %1231 = vmatpush.msra.mxu2 %v969_v17  ;;  %1251 = vmatpush.msra.mxu3 %v970_v30 }
 0x3ae   : > { %1431 = vmatmul.msk.f32.vlgmr.msra.gmra.mxu2 %vm1206_vm2, %v1205_v31  ;;  %1433 = vmatmul.msk.f32.vlgmr.msra.gmra.mxu3 %vm1206_vm2, %v1205_v31 }
 0x431   : > { %v1233_v13 = vpop.f32.mrf.mxu2  ;;  %v1253_v33 = vpop.f32.mrf.mxu3 }
 0x432   : > { %v1260_v34 = vmul.f32 %v1259_v32, %v1233_v13  ;;  %vm1258_vm3 = vcmp.gt.f32.partialorder %v1253_v33, 0.0  ;;  %v1261_v35 = vmul.f32 %v1259_v32, %v1253_v33  ;;  %vm1257_vm4 = vcmp.gt.f32.partialorder %v1233_v13, 0.0 }
 0x434   : > { %v1263_v36 = vsel %vm1258_vm3, %v1253_v33, %v1261_v35  ;;  %v1262_v7 = vsel %vm1257_vm4, %v1233_v13, %v1260_v34 }
 0x435   : > { %v1266_v6 = vrot.slane %v1263_v36, 4 }
 0x437   : > { %v1267_v37 = vsel %vm371_vm0, %v1262_v7, %v1266_v6 }
 0x438   : > { %1269 = vst [vmem:[%s360_s28] sm:$0xff] %v1267_v37 }
 0x439   : > { %1703 = shalt.err (!%p1700_p9)
}
 0x43a   : > { %1460 = dma.vmem_to_hbm [thread:$0]  (%p1899_p4), %s1285_s29, 128, %s1287_s10, %s1271_s8  }
 0x43b PF: > { %s1298_s21 = sand.u32 1, %s1742_s24   ;;  %p2239_p10 = scmp.ge.s32.totalorder %s1754_s27, 2 }
 0x43c   : > { %s1299_s15 = scalar_lea.sflag [#allocation4], %s1298_s21 }
 0x43d   : > { %p1480_p13 = pnand %p2239_p10, %p1903_p6 }
 0x43f   : > { %p1481_p11 = pneg %p1480_p13 }
 0x441   : > { %1737 = dma.done.wait (%p1481_p11), %s1299_s15, 128  }
 0x442   : > { %1739 = vsyncadd (%p1481_p11), %s1299_s15, 4294967168  ;;  %p23_p0 = scmp.ge.s32.totalorder %s1873_s16, 4   ;;  %s2240_s24 = smov %s1746_s25 }
 0x443   : > { %s2241_s25 = smov %s1750_s26  ;;  %s2242_s26 = smov %s1884_s20 }
 0x444   : > { %s2243_s27 = smov %s1873_s16  ;;  %25 = sbr.rel (!%p23_p0) target bundleno = 11 (0xb), region = 123 }
 0x449   :  { %1305 = vsyncpa [#allocation3], 1 }
 0x44a   :  { %1307 = vsyncpa [#allocation3 + $0x1], 1 }
 0x44b   :  { %1308 = vsyncpa [#allocation7], 1 }
 0x44c   :  { %1309 = vsyncpa [#allocation10], 1 }
 0x44d   :  { %1310 = vsyncpa [#allocation4], 1 }
 0x44e   :  { %1312 = vsyncpa [#allocation4 + $0x1], 1 }
 0x44f   :  { %1313 = vsyncpa [#allocation5], 1 }
 0x450   :  { %1315 = vsyncpa [#allocation5 + $0x1], 1 }

</bundles_post_ra>
